<compile_context>
chip_gen: v6e
topology: v6e:2x2x1
jax: 0.10.0
libtpu: 0.0.40
codegen_flags: <defaults>
</compile_context>

<pallas_src>
import jax
import jax.numpy as jnp
from jax.experimental import pallas as pl
from jax.experimental.pallas import tpu as pltpu

H, W = 28, 28
KH, KW = 3, 3
OH, OW = H - KH + 1, W - KW + 1           # 26, 26
C_OUT = 44
HW = OH * OW                              # 676
FEAT = C_OUT * HW                         # 29744 (PyTorch flatten size)
N_CLASSES = 10
RCOLS = C_OUT * N_CLASSES                 # 440


def fused_kernel(pt_ref, wc_ref, wsm_ref, msk_ref, fold_ref, b_ref, o_ref):
    # pt_ref  : (1, 9, 676)   im2col patches of one image, (k, hw) order
    # wc_ref  : (44, 9)       conv weight (3x3 taps flattened)
    # wsm_ref : (676, 440)    linear weight; column c*10+n holds W2[n, c, :]
    # msk_ref : (44, 440)     channel-selection mask (1 where row c owns the column)
    # fold_ref: (440, 10)     tile(eye(10), (44,1)) -- folds per-channel partials
    # b_ref   : (1, 10)       linear bias
    # o_ref   : (1, 1, 10)    log-softmax output

    # Conv2d (bias-free) as one MXU matmul: (44, 9) x (9, 676) -> (44, 676).
    s = jnp.dot(wc_ref[...], pt_ref[0], preferred_element_type=jnp.float32)
    # Sigmoid: exp + approximate reciprocal, both on the EUP (frees VALU slots).
    a = pl.reciprocal(1.0 + jnp.exp(-s), approx=True)

    # Linear, block-diagonal formulation (no flatten / scatter of the activation):
    # r[c, c'*10+n] = sum_hw a[c, hw] * W2[n, c', hw]
    r = jnp.dot(a, wsm_ref[...], preferred_element_type=jnp.float32)      # (44, 440)
    # Keep only c == c' entries, reduce over channels (sublanes).
    v = jnp.sum(r * msk_ref[...], axis=0, keepdims=True)                  # (1, 440)
    # Fold the 44 per-channel partials of each class: (1,440) x (440,10) + bias.
    logits = jnp.dot(v, fold_ref[...],
                     preferred_element_type=jnp.float32) + b_ref[...]     # (1, 10)

    # LogSoftmax(dim=1), max-stabilized.
    m = jnp.max(logits, axis=-1, keepdims=True)
    z = logits - m
    lse = jnp.log(jnp.sum(jnp.exp(z), axis=-1, keepdims=True))
    o_ref[0] = z - lse


def prepare_params(conv_w, lin_w, lin_b):
    """One-time parameter prep (hoisted out of the per-call jitted forward)."""
    wc = conv_w.astype(jnp.float32).reshape(C_OUT, KH * KW)                # (44, 9)
    # (10, 29744) -> (10, 44, 676) -> (676, 44, 10) -> (676, 440); column c*10+n
    # of wsm is the weight row of class n restricted to channel c.
    wsm = jnp.transpose(
        lin_w.astype(jnp.float32).reshape(N_CLASSES, C_OUT, HW),
        (2, 1, 0)).reshape(HW, RCOLS)                                      # (676, 440)
    # msk[c, c'*10+n] = 1.0 iff c == c'
    msk = jnp.repeat(jnp.eye(C_OUT, dtype=jnp.float32), N_CLASSES, axis=1) # (44, 440)
    # fold[c*10+n, n'] = 1.0 iff n == n'
    fold = jnp.tile(jnp.eye(N_CLASSES, dtype=jnp.float32), (C_OUT, 1))     # (440, 10)
    b2 = lin_b.astype(jnp.float32).reshape(1, N_CLASSES)                   # (1, 10)
    return wc, wsm, msk, fold, b2


def forward(x, wc, wsm, msk, fold, b2):
    B = x.shape[0]
    img = x.reshape(B, 1, H, W).astype(jnp.float32)[:, 0]                  # (B, 28, 28)
    # im2col in (k, hw) order so the in-kernel conv is one (44,9)x(9,676) matmul.
    pt = jnp.stack(
        [img[:, dh:dh + OH, dw:dw + OW] for dh in range(KH) for dw in range(KW)],
        axis=1).reshape(B, KH * KW, HW)                                    # (B, 9, 676)

    out = pl.pallas_call(
        fused_kernel,
        out_shape=jax.ShapeDtypeStruct((B, 1, N_CLASSES), jnp.float32),
        grid=(B,),
        in_specs=[
            pl.BlockSpec((1, KH * KW, HW), lambda b: (b, 0, 0)),
            pl.BlockSpec((C_OUT, KH * KW), lambda b: (0, 0)),
            pl.BlockSpec((HW, RCOLS), lambda b: (0, 0)),
            pl.BlockSpec((C_OUT, RCOLS), lambda b: (0, 0)),
            pl.BlockSpec((RCOLS, N_CLASSES), lambda b: (0, 0)),
            pl.BlockSpec((1, N_CLASSES), lambda b: (0, 0)),
        ],
        out_specs=pl.BlockSpec((1, 1, N_CLASSES), lambda b: (b, 0, 0)),
        compiler_params=pltpu.CompilerParams(
            dimension_semantics=("parallel",)),
    )(pt, wc, wsm, msk, fold, b2)
    return out.reshape(B, N_CLASSES)


if __name__ == "__main__":
    key = jax.random.PRNGKey(0)
    k1, k2, k3, k4 = jax.random.split(key, 4)
    B = 2
    # Deterministic synthetic inputs/params (shapes from the nn.Module __init__).
    x = jax.random.normal(k1, (B, 1, H, W), dtype=jnp.float32)
    conv_w = jax.random.normal(k2, (C_OUT, 1, KH, KW), dtype=jnp.float32) / 3.0
    lin_w = jax.random.normal(k3, (N_CLASSES, FEAT), dtype=jnp.float32) / jnp.sqrt(FEAT)
    lin_b = jax.random.normal(k4, (N_CLASSES,), dtype=jnp.float32) * 0.01

    # One-time parameter preparation (not part of the per-call forward).
    wc, wsm, msk, fold, b2 = prepare_params(conv_w, lin_w, lin_b)
    wc, wsm, msk, fold, b2 = jax.block_until_ready((wc, wsm, msk, fold, b2))

    out = jax.jit(forward)(x, wc, wsm, msk, fold, b2)
    out = jax.block_until_ready(out)

    # Independent pure-JAX reference (same semantics as the PyTorch forward).
    ref_conv = jax.lax.conv_general_dilated(
        x, conv_w, window_strides=(1, 1), padding="VALID",
        dimension_numbers=("NCHW", "OIHW", "NCHW"))
    ref_act = jax.nn.sigmoid(ref_conv).reshape(B, FEAT)
    ref_logits = ref_act @ lin_w.T + lin_b
    ref_out = jax.nn.log_softmax(ref_logits, axis=1)

    assert out.shape == (B, N_CLASSES)
    # Slightly loose tolerance to accommodate the EUP approximate reciprocal.
    assert jnp.allclose(out, ref_out, atol=5e-3, rtol=5e-3)

    print("KERNEL_OK")
</pallas_src>

<mosaic_0001>
module attributes {stable_mosaic.version = 11 : i64} {
  func.func @fused_kernel(%arg0: i32, %arg1: memref<1x9x676xf32, #tpu.memory_space<vmem>>, %arg2: memref<44x9xf32, #tpu.memory_space<vmem>>, %arg3: memref<676x440xf32, #tpu.memory_space<vmem>>, %arg4: memref<44x440xf32, #tpu.memory_space<vmem>>, %arg5: memref<440x10xf32, #tpu.memory_space<vmem>>, %arg6: memref<1x10xf32, #tpu.memory_space<vmem>>, %arg7: memref<1x1x10xf32, #tpu.memory_space<vmem>>) attributes {dimension_semantics = [#tpu.dimension_semantics<parallel>], iteration_bounds = array<i64: 2>, scalar_prefetch = 0 : i64, scratch_operands = 0 : i64, tpu.core_type = #tpu.core_type<tc>, window_params = [{transform_indices = @transform_0, window_bounds = array<i64: 1, 9, 676>}, {pipeline_mode = #tpu.pipeline_mode<synchronous>, transform_indices = @transform_1, window_bounds = array<i64: 44, 9>}, {pipeline_mode = #tpu.pipeline_mode<synchronous>, transform_indices = @transform_2, window_bounds = array<i64: 676, 440>}, {pipeline_mode = #tpu.pipeline_mode<synchronous>, transform_indices = @transform_3, window_bounds = array<i64: 44, 440>}, {pipeline_mode = #tpu.pipeline_mode<synchronous>, transform_indices = @transform_4, window_bounds = array<i64: 440, 10>}, {pipeline_mode = #tpu.pipeline_mode<synchronous>, transform_indices = @transform_5, window_bounds = array<i64: 1, 10>}, {transform_indices = @transform_6, window_bounds = array<i64: 1, 1, 10>}]} {
    %c0 = arith.constant 0 : index
    %c0_0 = arith.constant 0 : index
    %0 = vector.load %arg2[%c0, %c0_0] : memref<44x9xf32, #tpu.memory_space<vmem>>, vector<44x9xf32>
    %c0_1 = arith.constant 0 : index
    %c0_2 = arith.constant 0 : index
    %c0_3 = arith.constant 0 : index
    %1 = vector.load %arg1[%c0_1, %c0_2, %c0_3] : memref<1x9x676xf32, #tpu.memory_space<vmem>>, vector<1x9x676xf32>
    %2 = vector.shape_cast %1 : vector<1x9x676xf32> to vector<9x676xf32>
    %cst = arith.constant dense<0.000000e+00> : vector<44x676xf32>
    %3 = tpu.matmul %0, %2, %cst {dimension_numbers = #tpu.dot_dimension_numbers<[1], [0], [0], [1], [0, 0, 1, 1], [], []>} : vector<44x9xf32>, vector<9x676xf32>, vector<44x676xf32> -> vector<44x676xf32>
    %cst_4 = arith.constant 0.000000e+00 : f32
    %4 = vector.broadcast %cst_4 : f32 to vector<44x676xf32>
    %5 = arith.subf %4, %3 : vector<44x676xf32>
    %6 = math.exp %5 : vector<44x676xf32>
    %cst_5 = arith.constant 1.000000e+00 : f32
    %7 = vector.broadcast %cst_5 : f32 to vector<44x676xf32>
    %8 = arith.addf %7, %6 : vector<44x676xf32>
    %9 = tpu.reciprocal %8 {approx = true} : vector<44x676xf32> -> vector<44x676xf32>
    %c0_6 = arith.constant 0 : index
    %c0_7 = arith.constant 0 : index
    %10 = vector.load %arg3[%c0_6, %c0_7] : memref<676x440xf32, #tpu.memory_space<vmem>>, vector<676x440xf32>
    %cst_8 = arith.constant dense<0.000000e+00> : vector<44x440xf32>
    %11 = tpu.matmul %9, %10, %cst_8 {dimension_numbers = #tpu.dot_dimension_numbers<[1], [0], [0], [1], [0, 0, 1, 1], [], []>} : vector<44x676xf32>, vector<676x440xf32>, vector<44x440xf32> -> vector<44x440xf32>
    %c0_9 = arith.constant 0 : index
    %c0_10 = arith.constant 0 : index
    %12 = vector.load %arg4[%c0_9, %c0_10] : memref<44x440xf32, #tpu.memory_space<vmem>>, vector<44x440xf32>
    %13 = arith.mulf %11, %12 : vector<44x440xf32>
    %cst_11 = arith.constant dense<0.000000e+00> : vector<440xf32>
    %14 = vector.multi_reduction <add>, %13, %cst_11 [0] : vector<44x440xf32> to vector<440xf32>
    %15 = vector.shape_cast %14 : vector<440xf32> to vector<1x440xf32>
    %c0_12 = arith.constant 0 : index
    %c0_13 = arith.constant 0 : index
    %16 = vector.load %arg5[%c0_12, %c0_13] : memref<440x10xf32, #tpu.memory_space<vmem>>, vector<440x10xf32>
    %cst_14 = arith.constant dense<0.000000e+00> : vector<1x10xf32>
    %17 = tpu.matmul %15, %16, %cst_14 {dimension_numbers = #tpu.dot_dimension_numbers<[1], [0], [0], [1], [0, 0, 1, 1], [], []>} : vector<1x440xf32>, vector<440x10xf32>, vector<1x10xf32> -> vector<1x10xf32>
    %c0_15 = arith.constant 0 : index
    %c0_16 = arith.constant 0 : index
    %18 = vector.load %arg6[%c0_15, %c0_16] : memref<1x10xf32, #tpu.memory_space<vmem>>, vector<1x10xf32>
    %19 = arith.addf %17, %18 : vector<1x10xf32>
    %cst_17 = arith.constant dense<0xFF800000> : vector<1xf32>
    %20 = vector.multi_reduction <maximumf>, %19, %cst_17 [1] : vector<1x10xf32> to vector<1xf32>
    %21 = vector.shape_cast %20 : vector<1xf32> to vector<1x1xf32>
    %22 = vector.broadcast %21 : vector<1x1xf32> to vector<1x10xf32>
    %23 = arith.subf %19, %22 : vector<1x10xf32>
    %24 = math.exp %23 : vector<1x10xf32>
    %cst_18 = arith.constant dense<0.000000e+00> : vector<1xf32>
    %25 = vector.multi_reduction <add>, %24, %cst_18 [1] : vector<1x10xf32> to vector<1xf32>
    %26 = vector.shape_cast %25 : vector<1xf32> to vector<1x1xf32>
    %27 = math.log %26 : vector<1x1xf32>
    %28 = vector.broadcast %27 : vector<1x1xf32> to vector<1x10xf32>
    %29 = arith.subf %23, %28 : vector<1x10xf32>
    %c0_19 = arith.constant 0 : index
    %c0_20 = arith.constant 0 : index
    %c0_21 = arith.constant 0 : index
    %30 = vector.load %arg7[%c0_19, %c0_20, %c0_21] : memref<1x1x10xf32, #tpu.memory_space<vmem>>, vector<1x1x10xf32>
    %31 = vector.shape_cast %30 : vector<1x1x10xf32> to vector<1x10xf32>
    %32 = vector.shape_cast %29 : vector<1x10xf32> to vector<1x1x10xf32>
    tpu.vector_store %arg7[%c0_19, %c0_20, %c0_21], %32 {strides = array<i32>} : memref<1x1x10xf32, #tpu.memory_space<vmem>>, vector<1x1x10xf32>,
    return
  }
  func.func @transform_0(%arg0: i32) -> (i32, i32, i32) {
    %c0_i32 = arith.constant 0 : i32
    %c0_i32_0 = arith.constant 0 : i32
    %c0_i32_1 = arith.constant 0 : i32
    return %arg0, %c0_i32, %c0_i32_0 : i32, i32, i32
  }
  func.func @transform_1(%arg0: i32) -> (i32, i32) {
    %c0_i32 = arith.constant 0 : i32
    %c0_i32_0 = arith.constant 0 : i32
    %c0_i32_1 = arith.constant 0 : i32
    return %c0_i32, %c0_i32_0 : i32, i32
  }
  func.func @transform_2(%arg0: i32) -> (i32, i32) {
    %c0_i32 = arith.constant 0 : i32
    %c0_i32_0 = arith.constant 0 : i32
    %c0_i32_1 = arith.constant 0 : i32
    return %c0_i32, %c0_i32_0 : i32, i32
  }
  func.func @transform_3(%arg0: i32) -> (i32, i32) {
    %c0_i32 = arith.constant 0 : i32
    %c0_i32_0 = arith.constant 0 : i32
    %c0_i32_1 = arith.constant 0 : i32
    return %c0_i32, %c0_i32_0 : i32, i32
  }
  func.func @transform_4(%arg0: i32) -> (i32, i32) {
    %c0_i32 = arith.constant 0 : i32
    %c0_i32_0 = arith.constant 0 : i32
    %c0_i32_1 = arith.constant 0 : i32
    return %c0_i32, %c0_i32_0 : i32, i32
  }
  func.func @transform_5(%arg0: i32) -> (i32, i32) {
    %c0_i32 = arith.constant 0 : i32
    %c0_i32_0 = arith.constant 0 : i32
    %c0_i32_1 = arith.constant 0 : i32
    return %c0_i32, %c0_i32_0 : i32, i32
  }
  func.func @transform_6(%arg0: i32) -> (i32, i32, i32) {
    %c0_i32 = arith.constant 0 : i32
    %c0_i32_0 = arith.constant 0 : i32
    %c0_i32_1 = arith.constant 0 : i32
    return %arg0, %c0_i32, %c0_i32_0 : i32, i32, i32
  }
}

</mosaic_0001>

<bundles_post_ra>
// kernel: forward.1
= control target key start
LH: loop header
LB: loop body
LE: loop exit
PB: predicated region body
PF: predicated region fallthrough
CT: control target
= control target key end

     0   :  { %11 = vsyncpa [#allocation3], 0  ;;  %s4252_s0 = inlined_call_operand.vmem [shape: f32[2,9,676], index: 0, kind: input, shape index: {}]   ;;  %s4253_s1 = inlined_call_operand.vmem [shape: f32[44,9], index: 1, kind: input, shape index: {}]   ;;  %s4254_s2 = inlined_call_operand.vmem [shape: f32[676,440], index: 2, kind: input, shape index: {}]   ;;  %s4255_s3 = inlined_call_operand.vmem [shape: f32[44,440], index: 3, kind: input, shape index: {}]   ;;  %s4256_s4 = inlined_call_operand.vmem [shape: f32[440,10], index: 4, kind: input, shape index: {}]   ;;  %s4257_s5 = inlined_call_operand.vmem [shape: f32[1,10], index: 5, kind: input, shape index: {}]   ;;  %s4258_s6 = inlined_call_operand.hbm [shape: f32[2,1,10], index: 6, kind: output, shape index: {}]  }
   0x1   :  { %13 = vsyncpa [#allocation3 + $0x1], 0  ;;  %s2526_s21 = smov 0   ;;  %s2528_s22 = smov 0  }
   0x2   :  { %s2530_s23 = smov 0   ;;  %s2532_s24 = smov 0  }
   0x3 LB: > { %s2547_s25 = sadd.s32 4294967295, %s2487_s24   ;;  %s2150_s26 = sadd.s32 4294967294, %s2487_s24   ;;  %s2487_s24 = sphi %s2532_s24, %s4264_s24   ;;  %s2483_s23 = sphi %s2530_s23, %s4263_s23   ;;  %s2479_s22 = sphi %s2528_s22, %s4262_s22   ;;  %s2475_s21 = sphi %s2526_s21, %s4261_s21  }
   0x4   : > { %s2551_s27 = sadd.s32 1, %s2487_s24   ;;  %s157_s28 = sadd.s32 1, %s2483_s23 }
   0x5   : > { %s154_s29 = ssub.s32 %s2487_s24, %s2551_s27  ;;  %p167_p0 = scmp.ne.s32.totalorder %s2483_s23, %s2479_s22 }
   0x6   : > { %p155_p1 = scmp.eq.s32.totalorder %s154_s29, 0  ;;  %p168_p2 = scmp.eq.s32.totalorder %s2547_s25, 1 }
   0x7   : > { %p173_p3 = scmp.ne.s32.totalorder %s2479_s22, %s2475_s21  ;;  %p174_p4 = scmp.eq.s32.totalorder %s2150_s26, 1 }
   0x8   : > { %s2562_s30 = scalar_select %p155_p1, %s2483_s23, %s157_s28  }
   0x9   : > { %p2564_p5 = por %p168_p2, %p167_p0  ;;  %p2568_p6 = por %p174_p4, %p173_p3 }
   0xa   : > { %p2153_p7 = scmp.ge.s32.totalorder %s2487_s24, 1  ;;  %p215_p8 = scmp.lt.s32.totalorder %s2487_s24, 3 }
   0xc   : > { %p216_p9 = pnand %p2153_p7, %p215_p8 }
   0xd   : > { %p244_p10 = scmp.lt.s32.totalorder (!%p216_p9), %s2547_s25, 1  ;;  %s242_s11 = sand.u32 (!%p216_p9), 1, %s2479_s22  }
   0xe   : > { %219 = sbr.rel (%p216_p9) target bundleno = 1163 (0x48b), region = 44  ;;  %s2196_s12 = sshll.u32 (!%p216_p9), %s2547_s25, 4 }
   0xf   : > { %s2093_s17 = scalar_lea.hbm (!%p216_p9), %s4258_s6, %s2196_s12  ;;  %s2083_s18 = scalar_lea.sflag (!%p216_p9), [#allocation3], %s242_s11 }
  0x10   : > { %s2490_s20 = smov (!%p216_p9), [#allocation2]  }
  0x11   : > { %s2431_s26 = sshll.u32 (!%p216_p9), %s2490_s20, 4  ;;  %s2432_s26 = int_to_ptr.vmem [resolvable:$false] %s2431_s26 }
  0x13   : > { %v2489_v0 = vmov 0.0   ;;  %s245_s9 = scalar_select %p244_p10, %s2547_s25, 1  ;;  %vm286_vm0 = vcmask 1040384   ;;  %v2594_v5 = vld [vmem:[%s4253_s1] sm:$0xff]  ;;  %vm267_vm1 = vcmask 72704   ;;  %v2599_v6 = vld [vmem:[%s4253_s1 + $0x8] sm:$0xff] }
  0x14   : > { %369 = vmatprep.mubr.f32.mxu0 %v2489_v0  ;;  %375 = vmatprep.mubr.f32.mxu1 %v2489_v0  ;;  %v2615_v12 = vld [vmem:[%s4253_s1 + $0x10] sm:$0xff]  ;;  %v849_v16 = vld [vmem:[%s4254_s2 + $0x1e8] sm:$0xff]  ;;  %v2632_v17 = vld [vmem:[%s4253_s1 + $0x18] sm:$0xff]  ;;  %vm1147_vm2 = vcmask 1043456   ;;  %vm1128_vm3 = vcmask 293888   ;;  %vm1850_vm4 = vcmask 457728  }
  0x15   : > { %s2238_s10 = smul.u32 96, %s245_s9  ;;  %v977_v18 = vld [vmem:[%s4254_s2 + $0x5e8] sm:$0xff]  ;;  %v976_v19 = vld [vmem:[%s4254_s2 + $0x5e0] sm:$0xff]  ;;  %vm1860_vm5 = vcmask 453632   ;;  %vm2068_vm6 = vcmask 73728   ;;  %s2433_s25 = scalar_lea.vmem %s2432_s26, 32 }
  0x16   : > { %v973_v20 = vld [vmem:[%s4254_s2 + $0x5c8] sm:$0xff]  ;;  %v2653_v21 = vld [vmem:[%s4253_s1 + $0x20] sm:$0xff] }
  0x17   : > { %s2581_s13 = scalar_lea.vmem %s4252_s0, %s2238_s10  ;;  %v972_v22 = vld [vmem:[%s4254_s2 + $0x5c0] sm:$0xff]  ;;  %v969_v23 = vld [vmem:[%s4254_s2 + $0x5a8] sm:$0xff] }
  0x18   : > { %v262_v1 = vld [vmem:[%s2581_s13 + $0x38] sm:$0x1]  ;;  %v261_v2 = vld [vmem:[%s2581_s13 + $0x30] sm:$0x1]  ;;  %v256_v3 = vld [vmem:[%s2581_s13 + $0x8] sm:$0xff] }
  0x19   : > { %2155 = vmatprep.subr.msk.mxu0 %vm286_vm0, %v262_v1  ;;  %2234 = vmatprep.subr.msk.mxu1 %vm286_vm0, %v262_v1  ;;  %v255_v4 = vld [vmem:[%s2581_s13] sm:$0xff]  ;;  %v264_v7 = vld [vmem:[%s2581_s13 + $0x48] sm:$0x1]  ;;  %v266_v9 = vld [vmem:[%s2581_s13 + $0x58] sm:$0x1] }
  0x1a   : > { %2156 = vmatpush1.msk.msra.mxu0 %vm286_vm0, %v261_v2  ;;  %2236 = vmatpush1.msk.msra.mxu1 %vm286_vm0, %v261_v2  ;;  %v263_v8 = vld [vmem:[%s2581_s13 + $0x40] sm:$0x1]  ;;  %v258_v10 = vld [vmem:[%s2581_s13 + $0x18] sm:$0xff]  ;;  %v265_v11 = vld [vmem:[%s2581_s13 + $0x50] sm:$0x1] }
  0x1b   : > { %335 = vmatprep.subr.mxu0 %v256_v3  ;;  %2235 = vmatprep.subr.mxu1 %v256_v3  ;;  %v260_v13 = vld [vmem:[%s2581_s13 + $0x28] sm:$0xff]  ;;  %v257_v14 = vld [vmem:[%s2581_s13 + $0x10] sm:$0xff]  ;;  %v259_v15 = vld [vmem:[%s2581_s13 + $0x20] sm:$0xff]  ;;  %s243_s13 = scalar_lea.vmem [#allocation2], %s242_s11 }
  0x1c   : > { %336 = vmatpush1.msra.mxu0 %v255_v4  ;;  %2237 = vmatpush1.msra.mxu1 %v255_v4  ;;  %v2670_v24 = vld [vmem:[%s4253_s1 + $0x28] sm:$0xf]  ;;  %v968_v25 = vld [vmem:[%s4254_s2 + $0x5a0] sm:$0xff]  ;;  %s2095_s14 = sshll.u32 %s243_s13, 4  ;;  %s2096_s14 = int_to_ptr.vmem [resolvable:$true] %s2095_s14 }
  0x1d   : > { %2157 = vmatmul.mubr.msk.f32.vlgmr.msra.gmra.mxu0 %vm267_vm1, %v2594_v5  ;;  %2158 = vmatmul.mubr.msk.f32.vlgmr.msra.gmra.mxu1 %vm267_vm1, %v2599_v6  ;;  %v965_v26 = vld [vmem:[%s4254_s2 + $0x588] sm:$0xff]  ;;  %v848_v27 = vld [vmem:[%s4254_s2 + $0x1e0] sm:$0xff]  ;;  %s2427_s19 = scalar_lea.vmem %s2096_s14, 16  ;;  %p2434_p0 = scmp.lt.s32.totalorder %s2096_s14, %s2432_s26 }
  0x1e   : > { %2163 = vmatprep.subr.msk.mxu1 %vm286_vm0, %v264_v7  ;;  %381 = vmatprep.mubr.f32.mxu1 %v2489_v0  ;;  %v845_v28 = vld [vmem:[%s4254_s2 + $0x1c8] sm:$0xff]  ;;  %v844_v29 = vld [vmem:[%s4254_s2 + $0x1c0] sm:$0xff]  ;;  %p2428_p11 = scmp.ne.s32.totalorder %s2096_s14, %s2427_s19  ;;  %p2435_p1 = scmp.lt.s32.totalorder %s2433_s25, %s2427_s19 }
  0x1f   : > { %2164 = vmatpush1.msk.msra.mxu1 %vm286_vm0, %v263_v8  ;;  %2171 = vmatprep.subr.msk.mxu0 %vm286_vm0, %v266_v9  ;;  %v841_v30 = vld [vmem:[%s4254_s2 + $0x1a8] sm:$0xff]  ;;  %v840_v31 = vld [vmem:[%s4254_s2 + $0x1a0] sm:$0xff] }
  0x20   : > { %436 = vmatprep.subr.mxu1 %v258_v10  ;;  %2172 = vmatpush1.msk.msra.mxu0 %vm286_vm0, %v265_v11  ;;  %v837_v32 = vld [vmem:[%s4254_s2 + $0x188] sm:$0xff]  ;;  %v836_v33 = vld [vmem:[%s4254_s2 + $0x180] sm:$0xff]  ;;  %p2429_p12 = pnand %p2428_p11, %p2564_p5  ;;  %p2436_p2 = por %p2435_p1, %p2434_p0 }
  0x21   : > { %2159 = vmatmul.mubr.msk.f32.gmra.mxu1 %vm267_vm1, %v2615_v12  ;;  %537 = vmatprep.subr.mxu0 %v260_v13  ;;  %v833_v34 = vld [vmem:[%s4254_s2 + $0x168] sm:$0xff]  ;;  %v832_v35 = vld [vmem:[%s4254_s2 + $0x160] sm:$0xff] }
  0x22   : > { %387 = vmatprep.mubr.f32.mxu1 %v2489_v0  ;;  %437 = vmatpush1.msra.mxu1 %v257_v14  ;;  %v829_v36 = vld [vmem:[%s4254_s2 + $0x148] sm:$0xff]  ;;  %v828_v37 = vld [vmem:[%s4254_s2 + $0x140] sm:$0xff]  ;;  %p2430_p13 = pneg %p2429_p12 }
  0x23   : > { %538 = vmatpush1.msra.mxu0 %v259_v15  ;;  %571 = vmatprep.mubr.f32.mxu0 %v2489_v0  ;;  %v825_v38 = vld [vmem:[%s4254_s2 + $0x128] sm:$0xff]  ;;  %v824_v39 = vld [vmem:[%s4254_s2 + $0x120] sm:$0xff] }
  0x24   : > { %2173 = vmatmul.mubr.msk.f32.vlgmr.msra.gmra.mxu0 %vm267_vm1, %v2594_v5  ;;  %1160 = vmatprep.subr.mxu1 %v849_v16  ;;  %v821_v40 = vld [vmem:[%s4254_s2 + $0x108] sm:$0xff]  ;;  %v820_v41 = vld [vmem:[%s4254_s2 + $0x100] sm:$0xff]  ;;  %p2437_p3 = pnand %p2436_p2, %p2430_p13 }
  0x25   : > { %2160 = vmatmul.mubr.msk.f32.gmra.mxu1 %vm267_vm1, %v2632_v17  ;;  %577 = vmatprep.mubr.f32.mxu0 %v2489_v0  ;;  %v817_v42 = vld [vmem:[%s4254_s2 + $0xe8] sm:$0xff]  ;;  %v816_v43 = vld [vmem:[%s4254_s2 + $0xe0] sm:$0xff] }
  0x26   : > { %393 = vmatprep.mubr.f32.mxu1 %v2489_v0  ;;  %1261 = vmatprep.subr.mxu0 %v977_v18  ;;  %v813_v44 = vld [vmem:[%s4254_s2 + $0xc8] sm:$0xff]  ;;  %v812_v45 = vld [vmem:[%s4254_s2 + $0xc0] sm:$0xff] }
  0x27   : > { %1262 = vmatpush1.msra.mxu0 %v976_v19  ;;  %v809_v46 = vld [vmem:[%s4254_s2 + $0xa8] sm:$0xff]  ;;  %v808_v47 = vld [vmem:[%s4254_s2 + $0xa0] sm:$0xff] }
  0x28   : > { %2174 = vmatmul.mubr.msk.f32.gmra.mxu0 %vm267_vm1, %v2599_v6  ;;  %1263 = vmatprep.subr.mxu0 %v973_v20  ;;  %v805_v48 = vld [vmem:[%s4254_s2 + $0x88] sm:$0xff]  ;;  %v804_v49 = vld [vmem:[%s4254_s2 + $0x80] sm:$0xff] }
  0x29   : > { %2161 = vmatmul.mubr.msk.f32.gmra.mxu1 %vm267_vm1, %v2653_v21  ;;  %583 = vmatprep.mubr.f32.mxu0 %v2489_v0  ;;  %v801_v50 = vld [vmem:[%s4254_s2 + $0x68] sm:$0xff]  ;;  %v800_v51 = vld [vmem:[%s4254_s2 + $0x60] sm:$0xff] }
  0x2a   : > { %399 = vmatprep.mubr.f32.mxu1 %v2489_v0  ;;  %1264 = vmatpush1.msra.mxu0 %v972_v22  ;;  %v797_v52 = vld [vmem:[%s4254_s2 + $0x48] sm:$0xff]  ;;  %v796_v53 = vld [vmem:[%s4254_s2 + $0x40] sm:$0xff] }
  0x2b   : > { %1265 = vmatprep.subr.mxu0 %v969_v23  ;;  %v964_v54 = vld [vmem:[%s4254_s2 + $0x580] sm:$0xff]  ;;  %v793_v55 = vld [vmem:[%s4254_s2 + $0x28] sm:$0xff] }
  0x2c   : > { %2175 = vmatmul.mubr.msk.f32.gmra.mxu0 %vm267_vm1, %v2615_v12  ;;  %v961_v56 = vld [vmem:[%s4254_s2 + $0x568] sm:$0xff]  ;;  %v792_v57 = vld [vmem:[%s4254_s2 + $0x20] sm:$0xff] }
  0x2d   : > { %2162 = vmatmul.mubr.msk.f32.gmra.mxu1 %vm267_vm1, %v2670_v24  ;;  %589 = vmatprep.mubr.f32.mxu0 %v2489_v0  ;;  %v960_v58 = vld [vmem:[%s4254_s2 + $0x560] sm:$0xff]  ;;  %v789_v59 = vld [vmem:[%s4254_s2 + $0x8] sm:$0xff] }
  0x2e   : > { %470 = vmatprep.mubr.f32.mxu1 %v2489_v0  ;;  %1266 = vmatpush1.msra.mxu0 %v968_v25  ;;  %v957_v60 = vld [vmem:[%s4254_s2 + $0x548] sm:$0xff]  ;;  %v788_v61 = vld [vmem:[%s4254_s2] sm:$0xff] }
  0x2f   : > { %1267 = vmatprep.subr.mxu0 %v965_v26  ;;  %v956_v62 = vld [vmem:[%s4254_s2 + $0x540] sm:$0xff]  ;;  %v913_v63 = vld [vmem:[%s4254_s2 + $0x3e8] sm:$0xff] }
  0x30   : > { %2176 = vmatmul.mubr.msk.f32.gmra.mxu0 %vm267_vm1, %v2632_v17  ;;  %v953_v1 = vld [vmem:[%s4254_s2 + $0x528] sm:$0xff]  ;;  %v912_v2 = vld [vmem:[%s4254_s2 + $0x3e0] sm:$0xff] }
  0x31   : > { %2165 = vmatmul.mubr.msk.f32.vlgmr.msra.gmra.mxu1 %vm267_vm1, %v2594_v5  ;;  %595 = vmatprep.mubr.f32.mxu0 %v2489_v0  ;;  %v952_v3 = vld [vmem:[%s4254_s2 + $0x520] sm:$0xff]  ;;  %v909_v4 = vld [vmem:[%s4254_s2 + $0x3c8] sm:$0xff] }
  0x32   : > { %476 = vmatprep.mubr.f32.mxu1 %v2489_v0  ;;  %1161 = vmatpush1.msra.mxu1 %v848_v27  ;;  %v949_v5 = vld [vmem:[%s4254_s2 + $0x508] sm:$0xff]  ;;  %v948_v7 = vld [vmem:[%s4254_s2 + $0x500] sm:$0xff] }
  0x33   : > { %1162 = vmatprep.subr.mxu1 %v845_v28  ;;  %1268 = vmatpush1.msra.mxu0 %v964_v54  ;;  %v905_v8 = vld [vmem:[%s4254_s2 + $0x3a8] sm:$0xff]  ;;  %v904_v10 = vld [vmem:[%s4254_s2 + $0x3a0] sm:$0xff] }
  0x34   : > { %2177 = vmatmul.mubr.msk.f32.gmra.mxu0 %vm267_vm1, %v2653_v21  ;;  %1163 = vmatpush1.msra.mxu1 %v844_v29  ;;  %v945_v9 = vld [vmem:[%s4254_s2 + $0x4e8] sm:$0xff]  ;;  %v944_v11 = vld [vmem:[%s4254_s2 + $0x4e0] sm:$0xff] }
  0x35   : > { %2166 = vmatmul.mubr.msk.f32.gmra.mxu1 %vm267_vm1, %v2599_v6  ;;  %601 = vmatprep.mubr.f32.mxu0 %v2489_v0  ;;  %v908_v6 = vld [vmem:[%s4254_s2 + $0x3c0] sm:$0xff]  ;;  %v941_v13 = vld [vmem:[%s4254_s2 + $0x4c8] sm:$0xff] }
  0x36   : > { %482 = vmatprep.mubr.f32.mxu1 %v2489_v0  ;;  %1164 = vmatprep.subr.mxu1 %v841_v30  ;;  %v900_v14 = vld [vmem:[%s4254_s2 + $0x380] sm:$0xff]  ;;  %v897_v16 = vld [vmem:[%s4254_s2 + $0x368] sm:$0xff] }
  0x37   : > { %1165 = vmatpush1.msra.mxu1 %v840_v31  ;;  %1269 = vmatprep.subr.mxu0 %v961_v56  ;;  %v940_v15 = vld [vmem:[%s4254_s2 + $0x4c0] sm:$0xff]  ;;  %v893_v20 = vld [vmem:[%s4254_s2 + $0x348] sm:$0xff] }
  0x38   : > { %2178 = vmatmul.mubr.msk.f32.gmra.mxu0 %vm267_vm1, %v2670_v24  ;;  %1166 = vmatprep.subr.mxu1 %v837_v32  ;;  %v896_v18 = vld [vmem:[%s4254_s2 + $0x360] sm:$0xff]  ;;  %v929_v25 = vld [vmem:[%s4254_s2 + $0x468] sm:$0xff] }
  0x39   : > { %2167 = vmatmul.mubr.msk.f32.gmra.mxu1 %vm267_vm1, %v2615_v12  ;;  %1270 = vmatpush1.msra.mxu0 %v960_v58  ;;  %v901_v12 = vld [vmem:[%s4254_s2 + $0x388] sm:$0xff]  ;;  %v936_v19 = vld [vmem:[%s4254_s2 + $0x4a0] sm:$0xff] }
  0x3a   : > { %488 = vmatprep.mubr.f32.mxu1 %v2489_v0  ;;  %1167 = vmatpush1.msra.mxu1 %v836_v33  ;;  %v892_v22 = vld [vmem:[%s4254_s2 + $0x340] sm:$0xff]  ;;  %v885_v28 = vld [vmem:[%s4254_s2 + $0x308] sm:$0xff] }
  0x3b   : > { %1168 = vmatprep.subr.mxu1 %v833_v34  ;;  %1271 = vmatprep.subr.mxu0 %v957_v60  ;;  %v932_v23 = vld [vmem:[%s4254_s2 + $0x480] sm:$0xff]  ;;  %v925_v29 = vld [vmem:[%s4254_s2 + $0x448] sm:$0xff] }
  0x3c   : > { %1169 = vmatpush1.msra.mxu1 %v832_v35  ;;  %1272 = vmatpush1.msra.mxu0 %v956_v62  ;;  %v888_v26 = vld [vmem:[%s4254_s2 + $0x320] sm:$0xff]  ;;  %v881_v32 = vld [vmem:[%s4254_s2 + $0x2e8] sm:$0xff] }
  0x3d   : > { %2168 = vmatmul.mubr.msk.f32.gmra.mxu1 %vm267_vm1, %v2632_v17  ;;  %1170 = vmatprep.subr.mxu1 %v829_v36  ;;  %v937_v17 = vld [vmem:[%s4254_s2 + $0x4a8] sm:$0xff]  ;;  %v928_v27 = vld [vmem:[%s4254_s2 + $0x460] sm:$0xff] }
  0x3e   : > { %494 = vmatprep.mubr.f32.mxu1 %v2489_v0  ;;  %1171 = vmatpush1.msra.mxu1 %v828_v37  ;;  %v884_v30 = vld [vmem:[%s4254_s2 + $0x300] sm:$0xff]  ;;  %v921_v33 = vld [vmem:[%s4254_s2 + $0x428] sm:$0xff] }
  0x3f   : > { %1172 = vmatprep.subr.mxu1 %v825_v38  ;;  %1273 = vmatprep.subr.mxu0 %v953_v1  ;;  %v924_v31 = vld [vmem:[%s4254_s2 + $0x440] sm:$0xff]  ;;  %v877_v36 = vld [vmem:[%s4254_s2 + $0x2c8] sm:$0xff] }
  0x40   : > { %1173 = vmatpush1.msra.mxu1 %v824_v39  ;;  %1274 = vmatpush1.msra.mxu0 %v952_v3  ;;  %v880_v34 = vld [vmem:[%s4254_s2 + $0x2e0] sm:$0xff]  ;;  %v917_v37 = vld [vmem:[%s4254_s2 + $0x408] sm:$0xff] }
  0x41   : > { %2169 = vmatmul.mubr.msk.f32.gmra.mxu1 %vm267_vm1, %v2653_v21  ;;  %1174 = vmatprep.subr.mxu1 %v821_v40  ;;  %v933_v21 = vld [vmem:[%s4254_s2 + $0x488] sm:$0xff]  ;;  %v920_v35 = vld [vmem:[%s4254_s2 + $0x420] sm:$0xff] }
  0x42   : > { %500 = vmatprep.mubr.f32.mxu1 %v2489_v0  ;;  %1175 = vmatpush1.msra.mxu1 %v820_v41  ;;  %v876_v38 = vld [vmem:[%s4254_s2 + $0x2c0] sm:$0xff]  ;;  %v873_v40 = vld [vmem:[%s4254_s2 + $0x2a8] sm:$0xff] }
  0x43   : > { %1176 = vmatprep.subr.mxu1 %v817_v42  ;;  %1275 = vmatprep.subr.mxu0 %v949_v5  ;;  %v916_v39 = vld [vmem:[%s4254_s2 + $0x400] sm:$0xff]  ;;  %v1041_v41 = vld [vmem:[%s4254_s2 + $0x7e8] sm:$0xff] }
  0x44   : > { %1177 = vmatpush1.msra.mxu1 %v816_v43  ;;  %1276 = vmatpush1.msra.mxu0 %v948_v7  ;;  %v872_v42 = vld [vmem:[%s4254_s2 + $0x2a0] sm:$0xff]  ;;  %v857_v56 = vld [vmem:[%s4254_s2 + $0x228] sm:$0xff] }
  0x45   : > { %2170 = vmatmul.mubr.msk.f32.gmra.mxu1 %vm267_vm1, %v2670_v24  ;;  %1178 = vmatprep.subr.mxu1 %v813_v44  ;;  %v889_v24 = vld [vmem:[%s4254_s2 + $0x328] sm:$0xff]  ;;  %v1040_v43 = vld [vmem:[%s4254_s2 + $0x7e0] sm:$0xff] }
  0x46   : > { %1179 = vmatpush1.msra.mxu1 %v812_v45  ;;  %1277 = vmatprep.subr.mxu0 %v945_v9  ;;  %v869_v44 = vld [vmem:[%s4254_s2 + $0x288] sm:$0xff]  ;;  %v860_v54 = vld [vmem:[%s4254_s2 + $0x240] sm:$0xff] }
  0x47   : > { %1180 = vmatprep.subr.mxu1 %v809_v46  ;;  %1278 = vmatpush1.msra.mxu0 %v944_v11  ;;  %v1037_v45 = vld [vmem:[%s4254_s2 + $0x7c8] sm:$0xff]  ;;  %v868_v46 = vld [vmem:[%s4254_s2 + $0x280] sm:$0xff] }
  0x48   : > { %1181 = vmatpush1.msra.mxu1 %v808_v47  ;;  %1279 = vmatprep.subr.mxu0 %v941_v13  ;;  %v1036_v47 = vld [vmem:[%s4254_s2 + $0x7c0] sm:$0xff]  ;;  %v853_v60 = vld [vmem:[%s4254_s2 + $0x208] sm:$0xff] }
  0x49   : > { %1182 = vmatprep.subr.mxu1 %v805_v48  ;;  %1280 = vmatpush1.msra.mxu0 %v940_v15  ;;  %v865_v48 = vld [vmem:[%s4254_s2 + $0x268] sm:$0xff]  ;;  %v856_v58 = vld [vmem:[%s4254_s2 + $0x220] sm:$0xff] }
  0x4a   : > { %1183 = vmatpush1.msra.mxu1 %v804_v49  ;;  %1281 = vmatprep.subr.mxu0 %v937_v17  ;;  %v1033_v49 = vld [vmem:[%s4254_s2 + $0x7a8] sm:$0xff]  ;;  %v852_v62 = vld [vmem:[%s4254_s2 + $0x200] sm:$0xff] }
  0x4b   : > { %1184 = vmatprep.subr.mxu1 %v801_v50  ;;  %1282 = vmatpush1.msra.mxu0 %v936_v19  ;;  %v864_v50 = vld [vmem:[%s4254_s2 + $0x260] sm:$0xff]  ;;  %v1017_v1 = vld [vmem:[%s4254_s2 + $0x728] sm:$0xff] }
  0x4c   : > { %1185 = vmatpush1.msra.mxu1 %v800_v51  ;;  %1283 = vmatprep.subr.mxu0 %v933_v21  ;;  %v1032_v51 = vld [vmem:[%s4254_s2 + $0x7a0] sm:$0xff] }
  0x4d   : > { %1186 = vmatprep.subr.mxu1 %v797_v52  ;;  %1284 = vmatpush1.msra.mxu0 %v932_v23  ;;  %v861_v52 = vld [vmem:[%s4254_s2 + $0x248] sm:$0xff]  ;;  %v1016_v3 = vld [vmem:[%s4254_s2 + $0x720] sm:$0xff] }
  0x4e   : > { %1187 = vmatpush1.msra.mxu1 %v796_v53  ;;  %1285 = vmatprep.subr.mxu0 %v929_v25  ;;  %v1029_v53 = vld [vmem:[%s4254_s2 + $0x788] sm:$0xff]  ;;  %v1012_v5 = vld [vmem:[%s4254_s2 + $0x700] sm:$0xff] }
  0x4f   : > { %1188 = vmatprep.subr.mxu1 %v793_v55  ;;  %1286 = vmatpush1.msra.mxu0 %v928_v27  ;;  %v1028_v55 = vld [vmem:[%s4254_s2 + $0x780] sm:$0xff] }
  0x50   : > { %1189 = vmatpush1.msra.mxu1 %v792_v57  ;;  %1287 = vmatprep.subr.mxu0 %v925_v29  ;;  %v1025_v57 = vld [vmem:[%s4254_s2 + $0x768] sm:$0xff]  ;;  %v1008_v7 = vld [vmem:[%s4254_s2 + $0x6e0] sm:$0xff] }
  0x51   : > { %1190 = vmatprep.subr.mxu1 %v789_v59  ;;  %1288 = vmatpush1.msra.mxu0 %v924_v31  ;;  %v1024_v59 = vld [vmem:[%s4254_s2 + $0x760] sm:$0xff] }
  0x52   : > { %1191 = vmatpush1.msra.mxu1 %v788_v61  ;;  %1289 = vmatprep.subr.mxu0 %v921_v33  ;;  %v1021_v61 = vld [vmem:[%s4254_s2 + $0x748] sm:$0xff]  ;;  %v1004_v9 = vld [vmem:[%s4254_s2 + $0x6c0] sm:$0xff] }
  0x53   : > { %1192 = vmatprep.subr.mxu1 %v913_v63  ;;  %1290 = vmatpush1.msra.mxu0 %v920_v35  ;;  %v1020_v63 = vld [vmem:[%s4254_s2 + $0x740] sm:$0xff] }
  0x54   : > { %1193 = vmatpush2.msra.mxu1 %v912_v2  ;;  %1291 = vmatprep.subr.mxu0 %v917_v37  ;;  %v1105_v2 = vld [vmem:[%s4254_s2 + $0x9e8] sm:$0xff]  ;;  %v1000_v11 = vld [vmem:[%s4254_s2 + $0x6a0] sm:$0xff] }
  0x55   : > { %1194 = vmatprep.subr.mxu1 %v909_v4  ;;  %1292 = vmatpush1.msra.mxu0 %v916_v39  ;;  %v1013_v4 = vld [vmem:[%s4254_s2 + $0x708] sm:$0xff]  ;;  %v996_v13 = vld [vmem:[%s4254_s2 + $0x680] sm:$0xff] }
  0x56   : > { %1195 = vmatpush2.msra.mxu1 %v908_v6  ;;  %1293 = vmatprep.subr.mxu0 %v1041_v41  ;;  %v1009_v6 = vld [vmem:[%s4254_s2 + $0x6e8] sm:$0xff]  ;;  %v992_v15 = vld [vmem:[%s4254_s2 + $0x660] sm:$0xff] }
  0x57   : > { %1196 = vmatprep.subr.mxu1 %v905_v8  ;;  %1294 = vmatpush2.msra.mxu0 %v1040_v43  ;;  %v1005_v8 = vld [vmem:[%s4254_s2 + $0x6c8] sm:$0xff]  ;;  %v988_v17 = vld [vmem:[%s4254_s2 + $0x640] sm:$0xff] }
  0x58   : > { %1197 = vmatpush2.msra.mxu1 %v904_v10  ;;  %1295 = vmatprep.subr.mxu0 %v1037_v45  ;;  %v1001_v10 = vld [vmem:[%s4254_s2 + $0x6a8] sm:$0xff]  ;;  %v984_v19 = vld [vmem:[%s4254_s2 + $0x620] sm:$0xff] }
  0x59   : > { %1198 = vmatprep.subr.mxu1 %v901_v12  ;;  %1296 = vmatpush2.msra.mxu0 %v1036_v47  ;;  %v997_v12 = vld [vmem:[%s4254_s2 + $0x688] sm:$0xff]  ;;  %v980_v21 = vld [vmem:[%s4254_s2 + $0x600] sm:$0xff] }
  0x5a   : > { %1199 = vmatpush2.msra.mxu1 %v900_v14  ;;  %1297 = vmatprep.subr.mxu0 %v1033_v49  ;;  %v993_v14 = vld [vmem:[%s4254_s2 + $0x668] sm:$0xff] }
  0x5b   : > { %1200 = vmatprep.subr.mxu1 %v897_v16  ;;  %1298 = vmatpush2.msra.mxu0 %v1032_v51  ;;  %v989_v16 = vld [vmem:[%s4254_s2 + $0x648] sm:$0xff] }
  0x5c   : > { %1201 = vmatpush2.msra.mxu1 %v896_v18  ;;  %1299 = vmatprep.subr.mxu0 %v1029_v53  ;;  %v985_v18 = vld [vmem:[%s4254_s2 + $0x628] sm:$0xff] }
  0x5d   : > { %1202 = vmatprep.subr.mxu1 %v893_v20  ;;  %1300 = vmatpush2.msra.mxu0 %v1028_v55  ;;  %v981_v20 = vld [vmem:[%s4254_s2 + $0x608] sm:$0xff] }
  0x5e   : > { %1203 = vmatpush2.msra.mxu1 %v892_v22  ;;  %1301 = vmatprep.subr.mxu0 %v1025_v57  ;;  %v851_v22 = vld [vmem:[%s4254_s2 + $0x1f8] sm:$0xff] }
  0x5f   : > { %1204 = vmatprep.subr.mxu1 %v889_v24  ;;  %1302 = vmatpush2.msra.mxu0 %v1024_v59 }
  0x60   : > { %1205 = vmatpush2.msra.mxu1 %v888_v26  ;;  %1303 = vmatprep.subr.mxu0 %v1021_v61 }
  0x61   : > { %1206 = vmatprep.subr.mxu1 %v885_v28  ;;  %1304 = vmatpush2.msra.mxu0 %v1020_v63 }
  0x62   : > { %1207 = vmatpush2.msra.mxu1 %v884_v30  ;;  %1305 = vmatprep.subr.mxu0 %v1017_v1 }
  0x63   : > { %1208 = vmatprep.subr.mxu1 %v881_v32  ;;  %1306 = vmatpush2.msra.mxu0 %v1016_v3 }
  0x64   : > { %1209 = vmatpush2.msra.mxu1 %v880_v34  ;;  %1307 = vmatprep.subr.mxu0 %v1013_v4 }
  0x65   : > { %1210 = vmatprep.subr.mxu1 %v877_v36  ;;  %1308 = vmatpush2.msra.mxu0 %v1012_v5 }
  0x66   : > { %1211 = vmatpush2.msra.mxu1 %v876_v38  ;;  %1309 = vmatprep.subr.mxu0 %v1009_v6 }
  0x67   : > { %1212 = vmatprep.subr.mxu1 %v873_v40  ;;  %1310 = vmatpush2.msra.mxu0 %v1008_v7 }
  0x68   : > { %1213 = vmatpush2.msra.mxu1 %v872_v42  ;;  %1311 = vmatprep.subr.mxu0 %v1005_v8 }
  0x69   : > { %1214 = vmatprep.subr.mxu1 %v869_v44  ;;  %1312 = vmatpush2.msra.mxu0 %v1004_v9 }
  0x6a   : > { %1215 = vmatpush2.msra.mxu1 %v868_v46  ;;  %1313 = vmatprep.subr.mxu0 %v1001_v10 }
  0x6b   : > { %1216 = vmatprep.subr.mxu1 %v865_v48  ;;  %1314 = vmatpush2.msra.mxu0 %v1000_v11 }
  0x6c   : > { %1217 = vmatpush2.msra.mxu1 %v864_v50  ;;  %1315 = vmatprep.subr.mxu0 %v997_v12 }
  0x6d   : > { %1218 = vmatprep.subr.mxu1 %v861_v52  ;;  %1316 = vmatpush2.msra.mxu0 %v996_v13 }
  0x6e   : > { %1219 = vmatpush2.msra.mxu1 %v860_v54  ;;  %1317 = vmatprep.subr.mxu0 %v993_v14 }
  0x6f   : > { %1220 = vmatprep.subr.mxu1 %v857_v56  ;;  %1318 = vmatpush2.msra.mxu0 %v992_v15 }
  0x70   : > { %1221 = vmatpush2.msra.mxu1 %v856_v58  ;;  %1319 = vmatprep.subr.mxu0 %v989_v16 }
  0x71   : > { %1222 = vmatprep.subr.mxu1 %v853_v60  ;;  %1320 = vmatpush2.msra.mxu0 %v988_v17 }
  0x72   : > { %1223 = vmatpush2.msra.mxu1 %v852_v62  ;;  %1321 = vmatprep.subr.mxu0 %v985_v18 }
  0x73   : > { %1362 = vmatprep.subr.mxu1 %v1105_v2  ;;  %1322 = vmatpush2.msra.mxu0 %v984_v19 }
  0x74   : > { %1323 = vmatprep.subr.mxu0 %v981_v20 }
  0x75   : > { %1324 = vmatpush2.msra.mxu0 %v980_v21 }
  0x76   : > { %1463 = vmatprep.subr.mxu0 %v851_v22 }
  0xdd   : > { %v371_v23 = vpop.f32.mrf.mxu0  ;;  %v377_v24 = vpop.f32.mrf.mxu1 }
  0xde   : > { %v608_v25 = vsub.f32 0.0, %v371_v23  ;;  %v614_v26 = vsub.f32 0.0, %v377_v24 }
  0xdf   : > { %v373_v27 = vpop.f32.mrf.mxu0  ;;  %v379_v28 = vpop.f32.mrf.mxu1 }
  0xe0   : > { %v644_v29 = vmul.f32 1.442695, %v608_v25  ;;  %v656_v30 = vmul.f32 1.442695, %v614_v26  ;;  %v609_v31 = vsub.f32 0.0, %v373_v27  ;;  %v615_v32 = vsub.f32 0.0, %v379_v28 }
  0xe1   : > { %v383_v33 = vpop.f32.mrf.mxu1 }
  0xe2   : > { %2279 = vpow2.f32 %v644_v29  ;;  %v646_v34 = vmul.f32 1.442695, %v609_v31  ;;  %v658_v35 = vmul.f32 1.442695, %v615_v32  ;;  %v620_v36 = vsub.f32 0.0, %v383_v33 }
  0xe3   : > { %2281 = vpow2.f32 %v656_v30  ;;  %v385_v37 = vpop.f32.mrf.mxu1 }
  0xe4   : > { %2283 = vpow2.f32 %v646_v34  ;;  %v668_v38 = vmul.f32 1.442695, %v620_v36  ;;  %v621_v39 = vsub.f32 0.0, %v385_v37  ;;  %v3075_v2 = vpop.f32.mrf.mxu0 }
  0xe5   : > { %2285 = vpow2.f32 %v658_v35  ;;  %v389_v40 = vpop.f32.mrf.mxu1  ;;  %v612_v35 = vsub.f32 0.0, %v3075_v2  ;;  %v1096_v2 = vld [vmem:[%s4254_s2 + $0x9a0] sm:$0xff] }
  0xe6   : > { %2287 = vpow2.f32 %v668_v38  ;;  %v670_v41 = vmul.f32 1.442695, %v621_v39  ;;  %v626_v42 = vsub.f32 0.0, %v389_v40  ;;  %v3077_v14 = vpop.f32.mrf.mxu0 }
  0xe7   : > { %v391_v43 = vpop.f32.mrf.mxu1 }
  0xe8   : > { %2289 = vpow2.f32 %v670_v41  ;;  %v680_v44 = vmul.f32 1.442695, %v626_v42  ;;  %v627_v45 = vsub.f32 0.0, %v391_v43  ;;  %v3079_v26 = vpop.f32.mrf.mxu0 }
  0xe9   : > { %v395_v46 = vpop.f32.mrf.mxu1 }
  0xea   : > { %2291 = vpow2.f32 %v680_v44  ;;  %v682_v47 = vmul.f32 1.442695, %v627_v45  ;;  %v632_v48 = vsub.f32 0.0, %v395_v46  ;;  %v3082_v39 = vpop.f32.mrf.mxu0 }
  0xeb   : > { %v397_v49 = vpop.f32.mrf.mxu1 }
  0xec   : > { %2293 = vpow2.f32 %v682_v47  ;;  %v692_v50 = vmul.f32 1.442695, %v632_v48  ;;  %v633_v51 = vsub.f32 0.0, %v397_v49  ;;  %v1104_v48 = vld [vmem:[%s4254_s2 + $0x9e0] sm:$0xff] }
  0xed   : > { %v401_v52 = vpop.f32.mrf.mxu1 }
  0xee   : > { %2295 = vpow2.f32 %v692_v50  ;;  %v694_v53 = vmul.f32 1.442695, %v633_v51  ;;  %v638_v55 = vsub.f32 0.0, %v401_v52  ;;  %v1101_v52 = vld [vmem:[%s4254_s2 + $0x9c8] sm:$0xff] }
  0xef   : > { %v2280_v54 = vpop.eup %2279  ;;  %v403_v56 = vpop.f32.mrf.mxu1 }
  0xf0   : > { %v2282_v57 = vpop.eup %2281  ;;  %v716_v58 = vadd.f32 1.0, %v2280_v54  ;;  %2297 = vpow2.f32 %v694_v53  ;;  %v639_v61 = vsub.f32 0.0, %v403_v56  ;;  %v704_v5 = vmul.f32 1.442695, %v638_v55  ;;  %v3099_v54 = vpop.f32.mrf.mxu0 }
  0xf1   : > { %v2284_v59 = vpop.eup %2283  ;;  %v722_v60 = vadd.f32 1.0, %v2282_v57  ;;  %v472_v62 = vpop.f32.mrf.mxu1  ;;  %v652_v53 = vmul.f32 1.442695, %v612_v35  ;;  %v1100_v57 = vld [vmem:[%s4254_s2 + $0x9c0] sm:$0xff] }
  0xf2   : > { %v2286_v63 = vpop.eup %2285  ;;  %2299 = vrcp.f32 %v716_v58  ;;  %v717_v1 = vadd.f32 1.0, %v2284_v59  ;;  %v610_v6 = vsub.f32 0.0, %v472_v62  ;;  %v706_v10 = vmul.f32 1.442695, %v639_v61  ;;  %v1097_v62 = vld [vmem:[%s4254_s2 + $0x9a8] sm:$0xff] }
  0xf3   : > { %v2288_v3 = vpop.eup %2287  ;;  %2301 = vrcp.f32 %v722_v60  ;;  %v723_v4 = vadd.f32 1.0, %v2286_v63  ;;  %v474_v7 = vpop.f32.mrf.mxu1  ;;  %v613_v58 = vsub.f32 0.0, %v3077_v14 }
  0xf4   : > { %2303 = vrcp.f32 %v717_v1  ;;  %v728_v8 = vadd.f32 1.0, %v2288_v3  ;;  %v611_v11 = vsub.f32 0.0, %v474_v7  ;;  %v648_v16 = vmul.f32 1.442695, %v610_v6  ;;  %v1093_v6 = vld [vmem:[%s4254_s2 + $0x988] sm:$0xff]  ;;  %v3120_v7 = vpop.f32.mrf.mxu0 }
  0xf5   : > { %v2290_v9 = vpop.eup %2289  ;;  %2305 = vrcp.f32 %v723_v4  ;;  %v478_v12 = vpop.f32.mrf.mxu1 }
  0xf6   : > { %2307 = vrcp.f32 %v728_v8  ;;  %v729_v13 = vadd.f32 1.0, %v2290_v9  ;;  %v616_v17 = vsub.f32 0.0, %v478_v12  ;;  %v650_v21 = vmul.f32 1.442695, %v611_v11 }
  0xf7   : > { %v2292_v15 = vpop.eup %2291  ;;  %2309 = vpow2.f32 %v704_v5  ;;  %v480_v18 = vpop.f32.mrf.mxu1  ;;  %v654_v12 = vmul.f32 1.442695, %v613_v58 }
  0xf8   : > { %2311 = vrcp.f32 %v729_v13  ;;  %v734_v19 = vadd.f32 1.0, %v2292_v15  ;;  %v617_v22 = vsub.f32 0.0, %v480_v18  ;;  %v660_v28 = vmul.f32 1.442695, %v616_v17  ;;  %v1092_v13 = vld [vmem:[%s4254_s2 + $0x980] sm:$0xff] }
  0xf9   : > { %v2294_v20 = vpop.eup %2293  ;;  %2313 = vpow2.f32 %v706_v10  ;;  %v484_v23 = vpop.f32.mrf.mxu1 }
  0xfa   : > { %2315 = vrcp.f32 %v734_v19  ;;  %v735_v24 = vadd.f32 1.0, %v2294_v20  ;;  %v622_v25 = vsub.f32 0.0, %v484_v23  ;;  %v662_v33 = vmul.f32 1.442695, %v617_v22  ;;  %v1088_v19 = vld [vmem:[%s4254_s2 + $0x960] sm:$0xff]  ;;  %v1085_v23 = vld [vmem:[%s4254_s2 + $0x948] sm:$0xff] }
  0xfb   : > { %v2296_v27 = vpop.eup %2295  ;;  %2317 = vpow2.f32 %v648_v16  ;;  %v486_v29 = vpop.f32.mrf.mxu1  ;;  %v1089_v16 = vld [vmem:[%s4254_s2 + $0x968] sm:$0xff]  ;;  %v619_v22 = vsub.f32 0.0, %v3082_v39 }
  0xfc   : > { %2319 = vrcp.f32 %v735_v24  ;;  %v740_v30 = vadd.f32 1.0, %v2296_v27  ;;  %v623_v31 = vsub.f32 0.0, %v486_v29  ;;  %v672_v37 = vmul.f32 1.442695, %v622_v25  ;;  %v3141_v24 = vpop.f32.mrf.mxu0  ;;  %v1084_v29 = vld [vmem:[%s4254_s2 + $0x940] sm:$0xff] }
  0xfd   : > { %v2298_v32 = vpop.eup %2297  ;;  %2321 = vpow2.f32 %v650_v21  ;;  %v490_v34 = vpop.f32.mrf.mxu1 }
  0xfe   : > { %2323 = vrcp.f32 %v740_v30  ;;  %v741_v36 = vadd.f32 1.0, %v2298_v32  ;;  %v628_v38 = vsub.f32 0.0, %v490_v34  ;;  %v674_v41 = vmul.f32 1.442695, %v623_v31  ;;  %v1081_v31 = vld [vmem:[%s4254_s2 + $0x928] sm:$0xff]  ;;  %v1080_v34 = vld [vmem:[%s4254_s2 + $0x920] sm:$0xff]  ;;  %v3162_v39 = vpop.f32.mrf.mxu0 }
  0xff   : > { %v3084_v40 = vpop.eup %2299  ;;  %2325 = vpow2.f32 %v660_v28  ;;  %v492_v42 = vpop.f32.mrf.mxu1 }
 0x100   : > { %v3086_v43 = vpop.eup %2301  ;;  %2327 = vrcp.f32 %v741_v36  ;;  %v684_v44 = vmul.f32 1.442695, %v628_v38  ;;  %v629_v45 = vsub.f32 0.0, %v492_v42  ;;  %v618_v36 = vsub.f32 0.0, %v3079_v26  ;;  %v1077_v38 = vld [vmem:[%s4254_s2 + $0x908] sm:$0xff] }
 0x101   : > { %v3088_v46 = vpop.eup %2303  ;;  %2329 = vpow2.f32 %v662_v33  ;;  %v496_v47 = vpop.f32.mrf.mxu1 }
 0x102   : > { %v3093_v49 = vpop.eup %2305  ;;  %2331 = vpow2.f32 %v672_v37  ;;  %v686_v50 = vmul.f32 1.442695, %v629_v45  ;;  %v634_v51 = vsub.f32 0.0, %v496_v47  ;;  %1224 = vmatprep.mubr.f32.mxu1 %v3088_v46  ;;  %v666_v37 = vmul.f32 1.442695, %v619_v22  ;;  %v1073_v47 = vld [vmem:[%s4254_s2 + $0x8e8] sm:$0xff] }
 0x103   : > { %v3101_v55 = vpop.eup %2307  ;;  %2333 = vpow2.f32 %v674_v41  ;;  %v498_v56 = vpop.f32.mrf.mxu1  ;;  %1225 = vmatmul.mubr.f32.vlgmr.msra.gmra.mxu1 %v3084_v40  ;;  %v850_v22 = vld [vmem:[%s4254_s2 + $0x1f0] sm:$0xff] }
 0x104   : > { %v2310_v59 = vpop.eup %2309  ;;  %2335 = vpow2.f32 %v684_v44  ;;  %v696_v60 = vmul.f32 1.442695, %v634_v51  ;;  %v635_v61 = vsub.f32 0.0, %v498_v56  ;;  %1363 = vmatpush1.msra.mxu1 %v1104_v48  ;;  %1230 = vmatprep.mubr.f32.mxu1 %v3093_v49  ;;  %v1076_v44 = vld [vmem:[%s4254_s2 + $0x900] sm:$0xff]  ;;  %v1069_v56 = vld [vmem:[%s4254_s2 + $0x8c8] sm:$0xff] }
 0x105   : > { %v3112_v63 = vpop.eup %2311  ;;  %2337 = vpow2.f32 %v686_v50  ;;  %1364 = vmatprep.subr.mxu1 %v1101_v52  ;;  %v502_v1 = vpop.f32.mrf.mxu1  ;;  %v746_v4 = vadd.f32 1.0, %v2310_v59  ;;  %v1072_v51 = vld [vmem:[%s4254_s2 + $0x8e0] sm:$0xff]  ;;  %v624_v59 = vsub.f32 0.0, %v3099_v54 }
 0x106   : > { %v2314_v3 = vpop.eup %2313  ;;  %v698_v5 = vmul.f32 1.442695, %v635_v61  ;;  %1365 = vmatpush1.msra.mxu1 %v1100_v57  ;;  %2339 = vpow2.f32 %v652_v53  ;;  %v640_v10 = vsub.f32 0.0, %v502_v1  ;;  %v664_v53 = vmul.f32 1.442695, %v618_v36  ;;  %v3178_v57 = vpop.f32.mrf.mxu0 }
 0x107   : > { %v3122_v8 = vpop.eup %2315  ;;  %v747_v9 = vadd.f32 1.0, %v2314_v3  ;;  %2341 = vpow2.f32 %v696_v60  ;;  %1366 = vmatprep.subr.mxu1 %v1097_v62  ;;  %v504_v11 = vpop.f32.mrf.mxu1  ;;  %1231 = vmatmul.mubr.f32.gmra.mxu1 %v3086_v43  ;;  %v1068_v60 = vld [vmem:[%s4254_s2 + $0x8c0] sm:$0xff]  ;;  %v625_v1 = vsub.f32 0.0, %v3120_v7  ;;  %v676_v7 = vmul.f32 1.442695, %v624_v59 }
 0x108   : > { %v2318_v14 = vpop.eup %2317  ;;  %2343 = vpow2.f32 %v698_v5  ;;  %v641_v15 = vsub.f32 0.0, %v504_v11  ;;  %1367 = vmatpush1.msra.mxu1 %v1096_v2  ;;  %1236 = vmatprep.mubr.f32.mxu1 %v3112_v63  ;;  %v708_v28 = vmul.f32 1.442695, %v640_v10  ;;  %v1065_v2 = vld [vmem:[%s4254_s2 + $0x8a8] sm:$0xff]  ;;  %v1064_v5 = vld [vmem:[%s4254_s2 + $0x8a0] sm:$0xff]  ;;  %v631_v10 = vsub.f32 0.0, %v3162_v39 }
 0x109   : > { %v3132_v17 = vpop.eup %2319  ;;  %2345 = vrcp.f32 %v747_v9  ;;  %v718_v18 = vadd.f32 1.0, %v2318_v14  ;;  %1368 = vmatprep.subr.mxu1 %v1093_v6  ;;  %v599_v6 = vpop.f32.mrf.mxu0  ;;  %v1061_v11 = vld [vmem:[%s4254_s2 + $0x888] sm:$0xff]  ;;  %v1060_v14 = vld [vmem:[%s4254_s2 + $0x880] sm:$0xff] }
 0x10a   : > { %v2322_v20 = vpop.eup %2321  ;;  %2347 = vrcp.f32 %v746_v4  ;;  %v710_v21 = vmul.f32 1.442695, %v641_v15  ;;  %1369 = vmatpush1.msra.mxu1 %v1092_v13  ;;  %v678_v13 = vmul.f32 1.442695, %v625_v1  ;;  %v1048_v1 = vld [vmem:[%s4254_s2 + $0x820] sm:$0xff] }
 0x10b   : > { %v3143_v25 = vpop.eup %2323  ;;  %v719_v27 = vadd.f32 1.0, %v2322_v20  ;;  %2349 = vpow2.f32 %v654_v12  ;;  %1370 = vmatprep.subr.mxu1 %v1089_v16  ;;  %1237 = vmatmul.mubr.f32.gmra.mxu1 %v3101_v55 }
 0x10c   : > { %v2326_v30 = vpop.eup %2325  ;;  %2351 = vrcp.f32 %v718_v18  ;;  %1371 = vmatpush1.msra.mxu1 %v1088_v19  ;;  %1242 = vmatprep.mubr.f32.mxu1 %v3132_v17  ;;  %v630_v18 = vsub.f32 0.0, %v3141_v24  ;;  %v1057_v19 = vld [vmem:[%s4254_s2 + $0x868] sm:$0xff] }
 0x10d   : > { %v3153_v32 = vpop.eup %2327  ;;  %2353 = vrcp.f32 %v719_v27  ;;  %v724_v33 = vadd.f32 1.0, %v2326_v30  ;;  %1372 = vmatprep.subr.mxu1 %v1085_v23  ;;  %v3218_v23 = vpop.f32.mrf.mxu0  ;;  %v1056_v27 = vld [vmem:[%s4254_s2 + $0x860] sm:$0xff]  ;;  %v1053_v30 = vld [vmem:[%s4254_s2 + $0x848] sm:$0xff] }
 0x10e   : > { %v2330_v35 = vpop.eup %2329  ;;  %2355 = vpow2.f32 %v710_v21  ;;  %1373 = vmatpush1.msra.mxu1 %v1084_v29  ;;  %v847_v29 = vld [vmem:[%s4254_s2 + $0x1d8] sm:$0xff] }
 0x10f   : > { %v2332_v41 = vpop.eup %2331  ;;  %v725_v42 = vadd.f32 1.0, %v2330_v35  ;;  %2357 = vpow2.f32 %v708_v28  ;;  %1374 = vmatprep.subr.mxu1 %v1081_v31  ;;  %1243 = vmatmul.mubr.f32.gmra.mxu1 %v3122_v8  ;;  %v690_v28 = vmul.f32 1.442695, %v631_v10  ;;  %v846_v35 = vld [vmem:[%s4254_s2 + $0x1d0] sm:$0xff] }
 0x110   : > { %v2334_v45 = vpop.eup %2333  ;;  %2359 = vrcp.f32 %v724_v33  ;;  %v730_v26 = vadd.f32 1.0, %v2332_v41  ;;  %1375 = vmatpush1.msra.mxu1 %v1080_v34  ;;  %1248 = vmatprep.mubr.f32.mxu1 %v3153_v32  ;;  %v637_v34 = vsub.f32 0.0, %v599_v6  ;;  %v830_v10 = vld [vmem:[%s4254_s2 + $0x150] sm:$0xff] }
 0x111   : > { %v2336_v48 = vpop.eup %2335  ;;  %2361 = vrcp.f32 %v725_v42  ;;  %v731_v50 = vadd.f32 1.0, %v2334_v45  ;;  %1376 = vmatprep.subr.mxu1 %v1077_v38  ;;  %v843_v38 = vld [vmem:[%s4254_s2 + $0x1b8] sm:$0xff]  ;;  %v636_v42 = vsub.f32 0.0, %v3178_v57  ;;  %v605_v45 = vpop.f32.mrf.mxu0 }
 0x112   : > { %v2338_v52 = vpop.eup %2337  ;;  %2363 = vpow2.f32 %v666_v37  ;;  %1377 = vmatpush1.msra.mxu1 %v1076_v44  ;;  %v736_v4 = vadd.f32 1.0, %v2336_v48  ;;  %v688_v37 = vmul.f32 1.442695, %v630_v18  ;;  %v842_v44 = vld [vmem:[%s4254_s2 + $0x1b0] sm:$0xff]  ;;  %v827_v18 = vld [vmem:[%s4254_s2 + $0x138] sm:$0xff] }
 0x113   : > { %v3180_v58 = vpop.eup %2339  ;;  %2365 = vrcp.f32 %v731_v50  ;;  %1378 = vmatprep.subr.mxu1 %v1073_v47  ;;  %1249 = vmatmul.mubr.f32.gmra.mxu1 %v3143_v25  ;;  %v737_v62 = vadd.f32 1.0, %v2338_v52  ;;  %v839_v50 = vld [vmem:[%s4254_s2 + $0x198] sm:$0xff]  ;;  %v702_v52 = vmul.f32 1.442695, %v637_v34  ;;  %v1117_v34 = vld [vmem:[%s4254_s2 + $0xa48] sm:$0xff] }
 0x114   : > { %v2342_v61 = vpop.eup %2341  ;;  %2367 = vrcp.f32 %v730_v26  ;;  %1379 = vmatpush1.msra.mxu1 %v1072_v51  ;;  %v1052_v26 = vld [vmem:[%s4254_s2 + $0x840] sm:$0xff]  ;;  %v720_v59 = vadd.f32 1.0, %v3180_v58  ;;  %v834_v58 = vld [vmem:[%s4254_s2 + $0x170] sm:$0xff] }
 0x115   : > { %v2344_v3 = vpop.eup %2343  ;;  %1380 = vmatprep.subr.mxu1 %v1069_v56  ;;  %2369 = vpow2.f32 %v664_v53  ;;  %v742_v21 = vadd.f32 1.0, %v2342_v61  ;;  %v838_v53 = vld [vmem:[%s4254_s2 + $0x190] sm:$0xff]  ;;  %v1049_v56 = vld [vmem:[%s4254_s2 + $0x828] sm:$0xff]  ;;  %v835_v61 = vld [vmem:[%s4254_s2 + $0x178] sm:$0xff] }
 0x116   : > { %v3191_v54 = vpop.eup %2345  ;;  %1381 = vmatpush1.msra.mxu1 %v1068_v60  ;;  %2371 = vrcp.f32 %v737_v62  ;;  %v743_v16 = vadd.f32 1.0, %v2344_v3  ;;  %v643_v60 = vsub.f32 0.0, %v605_v45  ;;  %v700_v62 = vmul.f32 1.442695, %v636_v42  ;;  %v1116_v42 = vld [vmem:[%s4254_s2 + $0xa40] sm:$0xff] }
 0x117   : > { %v3196_v9 = vpop.eup %2347  ;;  %1254 = vmatprep.mubr.f32.mxu1 %v3191_v54  ;;  %1382 = vmatprep.subr.mxu1 %v1065_v2  ;;  %2373 = vrcp.f32 %v736_v4  ;;  %v642_v3 = vsub.f32 0.0, %v3218_v23  ;;  %v1045_v4 = vld [vmem:[%s4254_s2 + $0x808] sm:$0xff] }
 0x118   : > { %v2350_v12 = vpop.eup %2349  ;;  %1255 = vmatmul.mubr.f32.gmra.mxu1 %v3196_v9  ;;  %2375 = vpow2.f32 %v676_v7  ;;  %v1044_v7 = vld [vmem:[%s4254_s2 + $0x800] sm:$0xff] }
 0x119   : > { %v3207_v15 = vpop.eup %2351  ;;  %1383 = vmatpush1.msra.mxu1 %v1064_v5  ;;  %v721_v33 = vadd.f32 1.0, %v2350_v12  ;;  %2377 = vpow2.f32 %v678_v13  ;;  %v831_v5 = vld [vmem:[%s4254_s2 + $0x158] sm:$0xff]  ;;  %v714_v12 = vmul.f32 1.442695, %v643_v60  ;;  %v1125_v13 = vld [vmem:[%s4254_s2 + $0xa88] sm:$0xf] }
 0x11a   : > { %v3213_v20 = vpop.eup %2353  ;;  %1384 = vmatprep.subr.mxu1 %v1061_v11  ;;  %2379 = vrcp.f32 %v743_v16 }
 0x11b   : > { %v2356_v24 = vpop.eup %2355  ;;  %1325 = vmatprep.mubr.f32.mxu0 %v3213_v20  ;;  %1385 = vmatpush1.msra.mxu1 %v1060_v14  ;;  %2381 = vrcp.f32 %v742_v21  ;;  %v1124_v21 = vld [vmem:[%s4254_s2 + $0xa80] sm:$0xf] }
 0x11c   : > { %v2358_v31 = vpop.eup %2357  ;;  %1326 = vmatmul.mubr.f32.vlgmr.msra.gmra.mxu0 %v3207_v15  ;;  %1386 = vmatprep.subr.mxu1 %v1057_v19  ;;  %v749_v41 = vadd.f32 1.0, %v2356_v24  ;;  %2383 = vpow2.f32 %v690_v28  ;;  %v712_v19 = vmul.f32 1.442695, %v642_v3  ;;  %v823_v24 = vld [vmem:[%s4254_s2 + $0x118] sm:$0xff]  ;;  %v810_v3 = vld [vmem:[%s4254_s2 + $0xb0] sm:$0xff] }
 0x11d   : > { %v3234_v36 = vpop.eup %2359  ;;  %1464 = vmatpush1.msra.mxu0 %v850_v22  ;;  %1387 = vmatpush1.msra.mxu1 %v1056_v27  ;;  %v748_v48 = vadd.f32 1.0, %v2358_v31  ;;  %2385 = vrcp.f32 %v721_v33  ;;  %v826_v22 = vld [vmem:[%s4254_s2 + $0x130] sm:$0xff]  ;;  %v1121_v27 = vld [vmem:[%s4254_s2 + $0xa68] sm:$0xff] }
 0x11e   : > { %v3239_v39 = vpop.eup %2361  ;;  %1465 = vmatprep.subr.mxu0 %v847_v29  ;;  %1388 = vmatprep.subr.mxu1 %v1053_v30  ;;  %2387 = vpow2.f32 %v688_v37  ;;  %v1120_v29 = vld [vmem:[%s4254_s2 + $0xa60] sm:$0xff]  ;;  %v822_v30 = vld [vmem:[%s4254_s2 + $0x110] sm:$0xff]  ;;  %v819_v37 = vld [vmem:[%s4254_s2 + $0xf8] sm:$0xff] }
 0x11f   : > { %v2364_v47 = vpop.eup %2363  ;;  %1466 = vmatpush1.msra.mxu0 %v846_v35  ;;  %1331 = vmatprep.mubr.f32.mxu0 %v3239_v39  ;;  %2389 = vrcp.f32 %v749_v41 }
 0x120   : > { %v3252_v51 = vpop.eup %2365  ;;  %1467 = vmatprep.subr.mxu0 %v843_v38  ;;  %1332 = vmatmul.mubr.f32.gmra.mxu0 %v3234_v36  ;;  %2391 = vrcp.f32 %v748_v48  ;;  %v727_v6 = vadd.f32 1.0, %v2364_v47  ;;  %v815_v47 = vld [vmem:[%s4254_s2 + $0xd8] sm:$0xff] }
 0x121   : > { %v3261_v57 = vpop.eup %2367  ;;  %1468 = vmatpush1.msra.mxu0 %v842_v44  ;;  %1389 = vmatpush1.msra.mxu1 %v1052_v26  ;;  %2393 = vpow2.f32 %v702_v52  ;;  %v818_v44 = vld [vmem:[%s4254_s2 + $0xf0] sm:$0xff]  ;;  %v1113_v26 = vld [vmem:[%s4254_s2 + $0xa28] sm:$0xff] }
 0x122   : > { %1469 = vmatprep.subr.mxu0 %v839_v50  ;;  %1337 = vmatprep.mubr.f32.mxu0 %v3252_v51  ;;  %v2370_v2 = vpop.eup %2369  ;;  %2395 = vrcp.f32 %v720_v59  ;;  %v1112_v50 = vld [vmem:[%s4254_s2 + $0xa20] sm:$0xff]  ;;  %v814_v52 = vld [vmem:[%s4254_s2 + $0xd0] sm:$0xff]  ;;  %v1109_v59 = vld [vmem:[%s4254_s2 + $0xa08] sm:$0xff] }
 0x123   : > { %1470 = vmatpush1.msra.mxu0 %v838_v53  ;;  %1390 = vmatprep.subr.mxu1 %v1049_v56  ;;  %v3288_v11 = vpop.eup %2371  ;;  %v726_v16 = vadd.f32 1.0, %v2370_v2  ;;  %2397 = vpow2.f32 %v700_v62 }
 0x124   : > { %1471 = vmatprep.subr.mxu0 %v835_v61  ;;  %1338 = vmatmul.mubr.f32.gmra.mxu0 %v3261_v57  ;;  %v3293_v14 = vpop.eup %2373  ;;  %2399 = vrcp.f32 %v727_v6  ;;  %v811_v61 = vld [vmem:[%s4254_s2 + $0xb8] sm:$0xff] }
 0x125   : > { %1391 = vmatpush1.msra.mxu1 %v1048_v1  ;;  %1472 = vmatpush1.msra.mxu0 %v834_v58  ;;  %v2376_v23 = vpop.eup %2375  ;;  %2401 = vpow2.f32 %v714_v12  ;;  %v1108_v58 = vld [vmem:[%s4254_s2 + $0xa00] sm:$0xff] }
 0x126   : > { %1392 = vmatprep.subr.mxu1 %v1045_v4  ;;  %1473 = vmatprep.subr.mxu0 %v831_v5  ;;  %v2378_v28 = vpop.eup %2377  ;;  %2403 = vrcp.f32 %v726_v16  ;;  %v732_v41 = vadd.f32 1.0, %v2376_v23  ;;  %v807_v5 = vld [vmem:[%s4254_s2 + $0x98] sm:$0xff]  ;;  %v802_v23 = vld [vmem:[%s4254_s2 + $0x70] sm:$0xff] }
 0x127   : > { %1393 = vmatpush1.msra.mxu1 %v1044_v7  ;;  %1474 = vmatpush1.msra.mxu0 %v830_v10  ;;  %v3319_v31 = vpop.eup %2379  ;;  %v733_v33 = vadd.f32 1.0, %v2378_v28  ;;  %2405 = vpow2.f32 %v712_v19  ;;  %v979_v7 = vld [vmem:[%s4254_s2 + $0x5f8] sm:$0xff]  ;;  %v806_v10 = vld [vmem:[%s4254_s2 + $0x90] sm:$0xff] }
 0x128   : > { %1343 = vmatprep.mubr.f32.mxu0 %v3288_v11  ;;  %2179 = vmatprep.subr.msk.mxu1 %vm1147_vm2, %v1125_v13  ;;  %v3325_v35 = vpop.eup %2381  ;;  %v978_v13 = vld [vmem:[%s4254_s2 + $0x5f0] sm:$0xff]  ;;  %v803_v16 = vld [vmem:[%s4254_s2 + $0x78] sm:$0xff] }
 0x129   : > { %1475 = vmatprep.subr.mxu0 %v827_v18  ;;  %1344 = vmatmul.mubr.f32.gmra.mxu0 %v3293_v14  ;;  %v2384_v38 = vpop.eup %2383  ;;  %2407 = vrcp.f32 %v733_v33  ;;  %v970_v33 = vld [vmem:[%s4254_s2 + $0x5b0] sm:$0xff] }
 0x12a   : > { %2180 = vmatpush2.msk.msra.mxu1 %vm1147_vm2, %v1124_v21  ;;  %1476 = vmatpush1.msra.mxu0 %v826_v22  ;;  %v3336_v45 = vpop.eup %2385  ;;  %v739_v56 = vadd.f32 1.0, %v2384_v38  ;;  %2409 = vrcp.f32 %v732_v41  ;;  %v975_v21 = vld [vmem:[%s4254_s2 + $0x5d8] sm:$0xff] }
 0x12b   : > { %1418 = vmatprep.subr.mxu1 %v1121_v27  ;;  %1477 = vmatprep.subr.mxu0 %v823_v24  ;;  %v2388_v48 = vpop.eup %2387  ;;  %v974_v27 = vld [vmem:[%s4254_s2 + $0x5d0] sm:$0xff]  ;;  %v967_v41 = vld [vmem:[%s4254_s2 + $0x598] sm:$0xff] }
 0x12c   : > { %1419 = vmatpush2.msra.mxu1 %v1120_v29  ;;  %1478 = vmatpush1.msra.mxu0 %v822_v30  ;;  %v3352_v53 = vpop.eup %2389  ;;  %v738_v1 = vadd.f32 1.0, %v2388_v48  ;;  %2411 = vrcp.f32 %v739_v56  ;;  %v971_v29 = vld [vmem:[%s4254_s2 + $0x5b8] sm:$0xff]  ;;  %v798_v30 = vld [vmem:[%s4254_s2 + $0x50] sm:$0xff] }
 0x12d   : > { %1349 = vmatprep.mubr.f32.mxu0 %v3319_v31  ;;  %1420 = vmatprep.subr.mxu1 %v1117_v34  ;;  %v3357_v60 = vpop.eup %2391  ;;  %v795_v34 = vld [vmem:[%s4254_s2 + $0x38] sm:$0xff] }
 0x12e   : > { %1479 = vmatprep.subr.mxu0 %v819_v37  ;;  %1350 = vmatmul.mubr.f32.gmra.mxu0 %v3325_v35  ;;  %v2394_v62 = vpop.eup %2393  ;;  %2413 = vrcp.f32 %v738_v1  ;;  %v963_v48 = vld [vmem:[%s4254_s2 + $0x578] sm:$0xff]  ;;  %v958_v1 = vld [vmem:[%s4254_s2 + $0x550] sm:$0xff] }
 0x12f   : > { %1421 = vmatpush2.msra.mxu1 %v1116_v42  ;;  %1480 = vmatpush1.msra.mxu0 %v818_v44  ;;  %v3365_v2 = vpop.eup %2395  ;;  %v745_v6 = vadd.f32 1.0, %v2394_v62  ;;  %v794_v42 = vld [vmem:[%s4254_s2 + $0x30] sm:$0xff]  ;;  %v915_v56 = vld [vmem:[%s4254_s2 + $0x3f8] sm:$0xff] }
 0x130   : > { %1422 = vmatprep.subr.mxu1 %v1113_v26  ;;  %1481 = vmatprep.subr.mxu0 %v815_v47  ;;  %v2398_v4 = vpop.eup %2397  ;;  %v966_v44 = vld [vmem:[%s4254_s2 + $0x590] sm:$0xff]  ;;  %v791_v47 = vld [vmem:[%s4254_s2 + $0x18] sm:$0xff] }
 0x131   : > { %1423 = vmatpush2.msra.mxu1 %v1112_v50  ;;  %1482 = vmatpush1.msra.mxu0 %v814_v52  ;;  %v3383_v12 = vpop.eup %2399  ;;  %v744_v19 = vadd.f32 1.0, %v2398_v4  ;;  %2415 = vrcp.f32 %v745_v6  ;;  %v790_v50 = vld [vmem:[%s4254_s2 + $0x10] sm:$0xff]  ;;  %v955_v4 = vld [vmem:[%s4254_s2 + $0x538] sm:$0xff] }
 0x132   : > { %1355 = vmatprep.mubr.f32.mxu0 %v3352_v53  ;;  %1424 = vmatprep.subr.mxu1 %v1109_v59  ;;  %v2402_v18 = vpop.eup %2401  ;;  %v962_v52 = vld [vmem:[%s4254_s2 + $0x570] sm:$0xff] }
 0x133   : > { %1483 = vmatprep.subr.mxu0 %v811_v61  ;;  %1356 = vmatmul.mubr.f32.gmra.mxu0 %v3357_v60  ;;  %v3396_v22 = vpop.eup %2403  ;;  %v751_v28 = vadd.f32 1.0, %v2402_v18  ;;  %2417 = vrcp.f32 %v744_v19  ;;  %v959_v61 = vld [vmem:[%s4254_s2 + $0x558] sm:$0xff]  ;;  %v914_v62 = vld [vmem:[%s4254_s2 + $0x3f0] sm:$0xff] }
 0x134   : > { %1425 = vmatpush2.msra.mxu1 %v1108_v58  ;;  %2181 = vmatprep.mubr.msk.f32.mxu1 %vm1128_vm3, %v3336_v45  ;;  %v2406_v24 = vpop.eup %2405  ;;  %v954_v6 = vld [vmem:[%s4254_s2 + $0x530] sm:$0xff] }
 0x135   : > { %1484 = vmatpush1.msra.mxu0 %v810_v3  ;;  %1427 = vmatmul.mubr.f32.vlgmr.msra.gmra.mxu1 %v3365_v2  ;;  %v750_v38 = vadd.f32 1.0, %v2406_v24  ;;  %2419 = vrcp.f32 %v751_v28  ;;  %v911_v3 = vld [vmem:[%s4254_s2 + $0x3d8] sm:$0xff]  ;;  %v950_v18 = vld [vmem:[%s4254_s2 + $0x510] sm:$0xff] }
 0x136   : > { %1485 = vmatprep.subr.mxu0 %v807_v5  ;;  %1527 = vmatprep.mubr.f32.mxu0 %v3088_v46  ;;  %v799_v46 = vld [vmem:[%s4254_s2 + $0x58] sm:$0xff]  ;;  %v3421_v37 = vpop.eup %2407  ;;  %v910_v5 = vld [vmem:[%s4254_s2 + $0x3d0] sm:$0xff] }
 0x137   : > { %1564 = vmatprep.subr.mxu1 %v979_v7  ;;  %1486 = vmatpush1.msra.mxu0 %v806_v10  ;;  %v3433_v26 = vpop.eup %2409  ;;  %2421 = vrcp.f32 %v750_v38  ;;  %v907_v7 = vld [vmem:[%s4254_s2 + $0x3b8] sm:$0xff]  ;;  %v946_v24 = vld [vmem:[%s4254_s2 + $0x4f0] sm:$0xff] }
 0x138   : > { %1565 = vmatpush1.msra.mxu1 %v978_v13  ;;  %1487 = vmatprep.subr.mxu0 %v803_v16  ;;  %v951_v13 = vld [vmem:[%s4254_s2 + $0x518] sm:$0xff]  ;;  %v906_v16 = vld [vmem:[%s4254_s2 + $0x3b0] sm:$0xff] }
 0x139   : > { %1566 = vmatprep.subr.mxu1 %v975_v21  ;;  %2182 = vmatprep.mubr.msk.f32.mxu1 %vm1128_vm3, %v3383_v12  ;;  %v3452_v59 = vpop.eup %2411  ;;  %v903_v21 = vld [vmem:[%s4254_s2 + $0x398] sm:$0xff] }
 0x13a   : > { %1488 = vmatpush1.msra.mxu0 %v802_v23  ;;  %1567 = vmatpush1.msra.mxu1 %v974_v27  ;;  %v947_v23 = vld [vmem:[%s4254_s2 + $0x4f8] sm:$0xff]  ;;  %v902_v27 = vld [vmem:[%s4254_s2 + $0x390] sm:$0xff] }
 0x13b   : > { %1433 = vmatmul.mubr.f32.gmra.mxu1 %v3396_v22  ;;  %1489 = vmatprep.subr.mxu0 %v799_v46  ;;  %v3464_v58 = vpop.eup %2413  ;;  %v899_v46 = vld [vmem:[%s4254_s2 + $0x378] sm:$0xff] }
 0x13c   : > { %1568 = vmatprep.subr.mxu1 %v971_v29  ;;  %1490 = vmatpush1.msra.mxu0 %v798_v30  ;;  %v943_v29 = vld [vmem:[%s4254_s2 + $0x4d8] sm:$0xff]  ;;  %v898_v30 = vld [vmem:[%s4254_s2 + $0x370] sm:$0xff] }
 0x13d   : > { %1569 = vmatpush1.msra.mxu1 %v970_v33  ;;  %1491 = vmatprep.subr.mxu0 %v795_v34  ;;  %v942_v33 = vld [vmem:[%s4254_s2 + $0x4d0] sm:$0xff]  ;;  %v895_v38 = vld [vmem:[%s4254_s2 + $0x358] sm:$0xff] }
 0x13e   : > { %1570 = vmatprep.subr.mxu1 %v967_v41  ;;  %2183 = vmatprep.mubr.msk.f32.mxu1 %vm1128_vm3, %v3421_v37  ;;  %v3483_v10 = vpop.eup %2415  ;;  %v939_v41 = vld [vmem:[%s4254_s2 + $0x4b8] sm:$0xff] }
 0x13f   : > { %1492 = vmatpush1.msra.mxu0 %v794_v42  ;;  %1571 = vmatpush1.msra.mxu1 %v966_v44  ;;  %v894_v42 = vld [vmem:[%s4254_s2 + $0x350] sm:$0xff] }
 0x140   : > { %1439 = vmatmul.mubr.f32.gmra.mxu1 %v3433_v26  ;;  %1493 = vmatprep.subr.mxu0 %v791_v47  ;;  %v3495_v19 = vpop.eup %2417  ;;  %v938_v44 = vld [vmem:[%s4254_s2 + $0x4b0] sm:$0xff]  ;;  %v891_v47 = vld [vmem:[%s4254_s2 + $0x338] sm:$0xff] }
 0x141   : > { %1572 = vmatprep.subr.mxu1 %v963_v48  ;;  %1494 = vmatpush1.msra.mxu0 %v790_v50  ;;  %v935_v48 = vld [vmem:[%s4254_s2 + $0x498] sm:$0xff]  ;;  %v890_v50 = vld [vmem:[%s4254_s2 + $0x330] sm:$0xff] }
 0x142   : > { %1573 = vmatpush1.msra.mxu1 %v962_v52  ;;  %1495 = vmatprep.subr.mxu0 %v915_v56  ;;  %v3514_v28 = vpop.eup %2419  ;;  %v934_v52 = vld [vmem:[%s4254_s2 + $0x490] sm:$0xff]  ;;  %v887_v56 = vld [vmem:[%s4254_s2 + $0x318] sm:$0xff] }
 0x143   : > { %1574 = vmatprep.subr.mxu1 %v959_v61  ;;  %2184 = vmatprep.mubr.msk.f32.mxu1 %vm1128_vm3, %v3452_v59  ;;  %v931_v61 = vld [vmem:[%s4254_s2 + $0x478] sm:$0xff] }
 0x144   : > { %1496 = vmatpush2.msra.mxu0 %v914_v62  ;;  %1575 = vmatpush1.msra.mxu1 %v958_v1  ;;  %v3526_v34 = vpop.eup %2421  ;;  %v886_v62 = vld [vmem:[%s4254_s2 + $0x310] sm:$0xff] }
 0x145   : > { %1445 = vmatmul.mubr.f32.gmra.mxu1 %v3464_v58  ;;  %1497 = vmatprep.subr.mxu0 %v911_v3  ;;  %v930_v1 = vld [vmem:[%s4254_s2 + $0x470] sm:$0xff]  ;;  %v927_v3 = vld [vmem:[%s4254_s2 + $0x458] sm:$0xff] }
 0x146   : > { %1576 = vmatprep.subr.mxu1 %v955_v4  ;;  %1498 = vmatpush2.msra.mxu0 %v910_v5  ;;  %v882_v4 = vld [vmem:[%s4254_s2 + $0x2f0] sm:$0xff] }
 0x147   : > { %1577 = vmatpush1.msra.mxu1 %v954_v6  ;;  %1499 = vmatprep.subr.mxu0 %v907_v7  ;;  %v926_v5 = vld [vmem:[%s4254_s2 + $0x450] sm:$0xff]  ;;  %v879_v6 = vld [vmem:[%s4254_s2 + $0x2d8] sm:$0xff] }
 0x148   : > { %1578 = vmatprep.subr.mxu1 %v951_v13  ;;  %2185 = vmatprep.mubr.msk.f32.mxu1 %vm1128_vm3, %v3483_v10  ;;  %v923_v7 = vld [vmem:[%s4254_s2 + $0x438] sm:$0xff]  ;;  %v878_v13 = vld [vmem:[%s4254_s2 + $0x2d0] sm:$0xff] }
 0x149   : > { %1500 = vmatpush2.msra.mxu0 %v906_v16  ;;  %1579 = vmatpush1.msra.mxu1 %v950_v18  ;;  %v922_v16 = vld [vmem:[%s4254_s2 + $0x430] sm:$0xff]  ;;  %v875_v18 = vld [vmem:[%s4254_s2 + $0x2b8] sm:$0xff] }
 0x14a   : > { %1451 = vmatmul.mubr.f32.gmra.mxu1 %v3495_v19  ;;  %1501 = vmatprep.subr.mxu0 %v903_v21  ;;  %v919_v21 = vld [vmem:[%s4254_s2 + $0x418] sm:$0xff] }
 0x14b   : > { %1580 = vmatprep.subr.mxu1 %v947_v23  ;;  %1502 = vmatpush2.msra.mxu0 %v902_v27  ;;  %v874_v23 = vld [vmem:[%s4254_s2 + $0x2b0] sm:$0xff] }
 0x14c   : > { %1581 = vmatpush1.msra.mxu1 %v946_v24  ;;  %1503 = vmatprep.subr.mxu0 %v899_v46  ;;  %v918_v27 = vld [vmem:[%s4254_s2 + $0x410] sm:$0xff]  ;;  %v871_v24 = vld [vmem:[%s4254_s2 + $0x298] sm:$0xff] }
 0x14d   : > { %1582 = vmatprep.subr.mxu1 %v943_v29  ;;  %2186 = vmatprep.mubr.msk.f32.mxu1 %vm1128_vm3, %v3514_v28  ;;  %v1043_v46 = vld [vmem:[%s4254_s2 + $0x7f8] sm:$0xff]  ;;  %v870_v29 = vld [vmem:[%s4254_s2 + $0x290] sm:$0xff] }
 0x14e   : > { %1504 = vmatpush2.msra.mxu0 %v898_v30  ;;  %1583 = vmatpush1.msra.mxu1 %v942_v33  ;;  %v1042_v30 = vld [vmem:[%s4254_s2 + $0x7f0] sm:$0xff]  ;;  %v867_v33 = vld [vmem:[%s4254_s2 + $0x278] sm:$0xff] }
 0x14f   : > { %1457 = vmatmul.mubr.f32.gmra.mxu1 %v3526_v34  ;;  %1505 = vmatprep.subr.mxu0 %v895_v38  ;;  %v1039_v38 = vld [vmem:[%s4254_s2 + $0x7d8] sm:$0xff] }
 0x150   : > { %1584 = vmatprep.subr.mxu1 %v939_v41  ;;  %1506 = vmatpush2.msra.mxu0 %v894_v42  ;;  %v866_v41 = vld [vmem:[%s4254_s2 + $0x270] sm:$0xff] }
 0x151   : > { %1585 = vmatpush1.msra.mxu1 %v938_v44  ;;  %1628 = vmatprep.mubr.f32.mxu1 %v3213_v20  ;;  %v883_v20 = vld [vmem:[%s4254_s2 + $0x2f8] sm:$0xff]  ;;  %v1038_v42 = vld [vmem:[%s4254_s2 + $0x7d0] sm:$0xff] }
 0x152   : > { %1507 = vmatprep.subr.mxu0 %v891_v47  ;;  %1586 = vmatprep.subr.mxu1 %v935_v48  ;;  %v863_v44 = vld [vmem:[%s4254_s2 + $0x258] sm:$0xff]  ;;  %v862_v48 = vld [vmem:[%s4254_s2 + $0x250] sm:$0xff] }
 0x153   : > { %1508 = vmatpush2.msra.mxu0 %v890_v50  ;;  %1587 = vmatpush1.msra.mxu1 %v934_v52  ;;  %v1035_v47 = vld [vmem:[%s4254_s2 + $0x7b8] sm:$0xff]  ;;  %v1034_v50 = vld [vmem:[%s4254_s2 + $0x7b0] sm:$0xff] }
 0x154   : > { %1509 = vmatprep.subr.mxu0 %v887_v56  ;;  %1588 = vmatprep.subr.mxu1 %v931_v61  ;;  %v859_v52 = vld [vmem:[%s4254_s2 + $0x238] sm:$0xff]  ;;  %v858_v61 = vld [vmem:[%s4254_s2 + $0x230] sm:$0xff] }
 0x155   : > { %1510 = vmatpush2.msra.mxu0 %v886_v62  ;;  %1589 = vmatpush1.msra.mxu1 %v930_v1  ;;  %v1031_v56 = vld [vmem:[%s4254_s2 + $0x798] sm:$0xff]  ;;  %v1030_v62 = vld [vmem:[%s4254_s2 + $0x790] sm:$0xff] }
 0x156   : > { %1511 = vmatprep.subr.mxu0 %v883_v20  ;;  %1590 = vmatprep.subr.mxu1 %v927_v3  ;;  %v855_v1 = vld [vmem:[%s4254_s2 + $0x218] sm:$0xff]  ;;  %v854_v3 = vld [vmem:[%s4254_s2 + $0x210] sm:$0xff] }
 0x157   : > { %1512 = vmatpush2.msra.mxu0 %v882_v4  ;;  %1591 = vmatpush1.msra.mxu1 %v926_v5  ;;  %v1027_v20 = vld [vmem:[%s4254_s2 + $0x778] sm:$0xff]  ;;  %v1026_v4 = vld [vmem:[%s4254_s2 + $0x770] sm:$0xff] }
 0x158   : > { %1513 = vmatprep.subr.mxu0 %v879_v6  ;;  %1592 = vmatprep.subr.mxu1 %v923_v7  ;;  %v1023_v5 = vld [vmem:[%s4254_s2 + $0x758] sm:$0xff]  ;;  %v1022_v7 = vld [vmem:[%s4254_s2 + $0x750] sm:$0xff] }
 0x159   : > { %1514 = vmatpush2.msra.mxu0 %v878_v13  ;;  %1593 = vmatpush1.msra.mxu1 %v922_v16  ;;  %v1107_v6 = vld [vmem:[%s4254_s2 + $0x9f8] sm:$0xff]  ;;  %v1106_v13 = vld [vmem:[%s4254_s2 + $0x9f0] sm:$0xff] }
 0x15a   : > { %1515 = vmatprep.subr.mxu0 %v875_v18  ;;  %1594 = vmatprep.subr.mxu1 %v919_v21  ;;  %v1019_v16 = vld [vmem:[%s4254_s2 + $0x738] sm:$0xff]  ;;  %v1018_v21 = vld [vmem:[%s4254_s2 + $0x730] sm:$0xff] }
 0x15b   : > { %1516 = vmatpush2.msra.mxu0 %v874_v23  ;;  %1595 = vmatpush1.msra.mxu1 %v918_v27  ;;  %v1103_v18 = vld [vmem:[%s4254_s2 + $0x9d8] sm:$0xff]  ;;  %v1014_v27 = vld [vmem:[%s4254_s2 + $0x710] sm:$0xff] }
 0x15c   : > { %1517 = vmatprep.subr.mxu0 %v871_v24  ;;  %1596 = vmatprep.subr.mxu1 %v1043_v46  ;;  %v1015_v23 = vld [vmem:[%s4254_s2 + $0x718] sm:$0xff]  ;;  %v1098_v24 = vld [vmem:[%s4254_s2 + $0x9b0] sm:$0xff] }
 0x15d   : > { %1518 = vmatpush2.msra.mxu0 %v870_v29  ;;  %1597 = vmatpush2.msra.mxu1 %v1042_v30  ;;  %v1011_v46 = vld [vmem:[%s4254_s2 + $0x6f8] sm:$0xff]  ;;  %v1010_v30 = vld [vmem:[%s4254_s2 + $0x6f0] sm:$0xff] }
 0x15e   : > { %1519 = vmatprep.subr.mxu0 %v867_v33  ;;  %1598 = vmatprep.subr.mxu1 %v1039_v38  ;;  %v1095_v29 = vld [vmem:[%s4254_s2 + $0x998] sm:$0xff]  ;;  %v1006_v38 = vld [vmem:[%s4254_s2 + $0x6d0] sm:$0xff] }
 0x15f   : > { %1520 = vmatpush2.msra.mxu0 %v866_v41  ;;  %1599 = vmatpush2.msra.mxu1 %v1038_v42  ;;  %v1007_v33 = vld [vmem:[%s4254_s2 + $0x6d8] sm:$0xff]  ;;  %v1090_v41 = vld [vmem:[%s4254_s2 + $0x970] sm:$0xff] }
 0x160   : > { %1521 = vmatprep.subr.mxu0 %v863_v44  ;;  %1600 = vmatprep.subr.mxu1 %v1035_v47  ;;  %v1003_v42 = vld [vmem:[%s4254_s2 + $0x6b8] sm:$0xff]  ;;  %v1002_v47 = vld [vmem:[%s4254_s2 + $0x6b0] sm:$0xff] }
 0x161   : > { %1522 = vmatpush2.msra.mxu0 %v862_v48  ;;  %1601 = vmatpush2.msra.mxu1 %v1034_v50  ;;  %v1087_v44 = vld [vmem:[%s4254_s2 + $0x958] sm:$0xff]  ;;  %v998_v50 = vld [vmem:[%s4254_s2 + $0x690] sm:$0xff] }
 0x162   : > { %1523 = vmatprep.subr.mxu0 %v859_v52  ;;  %1602 = vmatprep.subr.mxu1 %v1031_v56  ;;  %v999_v48 = vld [vmem:[%s4254_s2 + $0x698] sm:$0xff]  ;;  %v1082_v52 = vld [vmem:[%s4254_s2 + $0x930] sm:$0xff] }
 0x163   : > { %1524 = vmatpush2.msra.mxu0 %v858_v61  ;;  %1603 = vmatpush2.msra.mxu1 %v1030_v62  ;;  %v995_v56 = vld [vmem:[%s4254_s2 + $0x678] sm:$0xff]  ;;  %v994_v62 = vld [vmem:[%s4254_s2 + $0x670] sm:$0xff] }
 0x164   : > { %1525 = vmatprep.subr.mxu0 %v855_v1  ;;  %1604 = vmatprep.subr.mxu1 %v1027_v20  ;;  %v1079_v61 = vld [vmem:[%s4254_s2 + $0x918] sm:$0xff]  ;;  %v990_v20 = vld [vmem:[%s4254_s2 + $0x650] sm:$0xff] }
 0x165   : > { %1526 = vmatpush2.msra.mxu0 %v854_v3  ;;  %1605 = vmatpush2.msra.mxu1 %v1026_v4  ;;  %v991_v1 = vld [vmem:[%s4254_s2 + $0x658] sm:$0xff]  ;;  %v1074_v3 = vld [vmem:[%s4254_s2 + $0x8f0] sm:$0xff] }
 0x166   : > { %1528 = vmatmul.mubr.f32.vlgmr.msra.gmra.mxu0 %v3084_v40  ;;  %1606 = vmatprep.subr.mxu1 %v1023_v5  ;;  %v1102_v40 = vld [vmem:[%s4254_s2 + $0x9d0] sm:$0xff]  ;;  %v987_v4 = vld [vmem:[%s4254_s2 + $0x638] sm:$0xff] }
 0x167   : > { %1665 = vmatprep.subr.mxu0 %v1107_v6  ;;  %1533 = vmatprep.mubr.f32.mxu0 %v3093_v49  ;;  %v1099_v49 = vld [vmem:[%s4254_s2 + $0x9b8] sm:$0xff]  ;;  %v986_v6 = vld [vmem:[%s4254_s2 + $0x630] sm:$0xff] }
 0x168   : > { %1607 = vmatpush2.msra.mxu1 %v1022_v7  ;;  %1666 = vmatpush1.msra.mxu0 %v1106_v13  ;;  %v1071_v5 = vld [vmem:[%s4254_s2 + $0x8d8] sm:$0xff]  ;;  %v982_v13 = vld [vmem:[%s4254_s2 + $0x610] sm:$0xff] }
 0x169   : > { %1608 = vmatprep.subr.mxu1 %v1019_v16  ;;  %1667 = vmatprep.subr.mxu0 %v1103_v18  ;;  %v983_v7 = vld [vmem:[%s4254_s2 + $0x618] sm:$0xff]  ;;  %v1066_v16 = vld [vmem:[%s4254_s2 + $0x8b0] sm:$0xff] }
 0x16a   : > { %1609 = vmatpush2.msra.mxu1 %v1018_v21  ;;  %1668 = vmatpush1.msra.mxu0 %v1102_v40  ;;  %v1063_v18 = vld [vmem:[%s4254_s2 + $0x898] sm:$0xff]  ;;  %v1062_v21 = vld [vmem:[%s4254_s2 + $0x890] sm:$0xff] }
 0x16b   : > { %1534 = vmatmul.mubr.f32.gmra.mxu0 %v3086_v43  ;;  %1610 = vmatprep.subr.mxu1 %v1015_v23  ;;  %v1094_v43 = vld [vmem:[%s4254_s2 + $0x990] sm:$0xff]  ;;  %v1059_v40 = vld [vmem:[%s4254_s2 + $0x878] sm:$0xff] }
 0x16c   : > { %1669 = vmatprep.subr.mxu0 %v1099_v49  ;;  %1539 = vmatprep.mubr.f32.mxu0 %v3112_v63  ;;  %v1091_v63 = vld [vmem:[%s4254_s2 + $0x978] sm:$0xff] }
 0x16d   : > { %1611 = vmatpush2.msra.mxu1 %v1014_v27  ;;  %1670 = vmatpush1.msra.mxu0 %v1098_v24  ;;  %v1055_v23 = vld [vmem:[%s4254_s2 + $0x858] sm:$0xff]  ;;  %v1126_v24 = vld [vmem:[%s4254_s2 + $0xa90] sm:$0xf] }
 0x16e   : > { %1612 = vmatprep.subr.mxu1 %v1011_v46  ;;  %1671 = vmatprep.subr.mxu0 %v1095_v29  ;;  %v1047_v49 = vld [vmem:[%s4254_s2 + $0x818] sm:$0xff]  ;;  %v1899_v29 = vld [vmem:[%s4256_s4 + $0xf0] sm:$0xff] }
 0x16f   : > { %1613 = vmatpush2.msra.mxu1 %v1010_v30  ;;  %1672 = vmatpush1.msra.mxu0 %v1094_v43  ;;  %v1900_v27 = vld [vmem:[%s4256_s4 + $0xf8] sm:$0xff]  ;;  %v1122_v30 = vld [vmem:[%s4254_s2 + $0xa70] sm:$0xff] }
 0x170   : > { %1540 = vmatmul.mubr.f32.gmra.mxu0 %v3101_v55  ;;  %1614 = vmatprep.subr.mxu1 %v1007_v33  ;;  %v1086_v55 = vld [vmem:[%s4254_s2 + $0x950] sm:$0xff]  ;;  %v1884_v46 = vld [vmem:[%s4256_s4 + $0x78] sm:$0xff] }
 0x171   : > { %1673 = vmatprep.subr.mxu0 %v1091_v63  ;;  %1545 = vmatprep.mubr.f32.mxu0 %v3132_v17  ;;  %v1083_v17 = vld [vmem:[%s4254_s2 + $0x938] sm:$0xff]  ;;  %v1118_v33 = vld [vmem:[%s4254_s2 + $0xa50] sm:$0xff]  ;;  %v1898_v63 = vld [vmem:[%s4256_s4 + $0xe8] sm:$0xff] }
 0x172   : > { %1615 = vmatpush2.msra.mxu1 %v1006_v38  ;;  %1674 = vmatpush1.msra.mxu0 %v1090_v41  ;;  %v1119_v43 = vld [vmem:[%s4254_s2 + $0xa58] sm:$0xff] }
 0x173   : > { %1616 = vmatprep.subr.mxu1 %v1003_v42  ;;  %1675 = vmatprep.subr.mxu0 %v1087_v44  ;;  %v1115_v38 = vld [vmem:[%s4254_s2 + $0xa38] sm:$0xff]  ;;  %v1110_v42 = vld [vmem:[%s4254_s2 + $0xa10] sm:$0xff]  ;;  %v1897_v44 = vld [vmem:[%s4256_s4 + $0xe0] sm:$0xff] }
 0x174   : > { %1617 = vmatpush2.msra.mxu1 %v1002_v47  ;;  %1676 = vmatpush1.msra.mxu0 %v1086_v55  ;;  %v1111_v41 = vld [vmem:[%s4254_s2 + $0xa18] sm:$0xff]  ;;  %v1881_v47 = vld [vmem:[%s4256_s4 + $0x60] sm:$0xff]  ;;  %v1895_v55 = vld [vmem:[%s4256_s4 + $0xd0] sm:$0xff] }
 0x175   : > { %1546 = vmatmul.mubr.f32.gmra.mxu0 %v3122_v8  ;;  %1618 = vmatprep.subr.mxu1 %v999_v48  ;;  %v1078_v8 = vld [vmem:[%s4254_s2 + $0x910] sm:$0xff] }
 0x176   : > { %1677 = vmatprep.subr.mxu0 %v1083_v17  ;;  %1551 = vmatprep.mubr.f32.mxu0 %v3153_v32  ;;  %v1075_v32 = vld [vmem:[%s4254_s2 + $0x8f8] sm:$0xff]  ;;  %v1879_v48 = vld [vmem:[%s4256_s4 + $0x50] sm:$0xff]  ;;  %v1877_v17 = vld [vmem:[%s4256_s4 + $0x40] sm:$0xff] }
 0x177   : > { %1619 = vmatpush2.msra.mxu1 %v998_v50  ;;  %1678 = vmatpush1.msra.mxu0 %v1082_v52  ;;  %v1891_v50 = vld [vmem:[%s4256_s4 + $0xb0] sm:$0xff] }
 0x178   : > { %1620 = vmatprep.subr.mxu1 %v995_v56  ;;  %1679 = vmatprep.subr.mxu0 %v1079_v61  ;;  %v1875_v52 = vld [vmem:[%s4256_s4 + $0x30] sm:$0xff]  ;;  %v1889_v56 = vld [vmem:[%s4256_s4 + $0xa0] sm:$0xff] }
 0x179   : > { %1621 = vmatpush2.msra.mxu1 %v994_v62  ;;  %1680 = vmatpush1.msra.mxu0 %v1078_v8  ;;  %v1873_v61 = vld [vmem:[%s4256_s4 + $0x20] sm:$0xff]  ;;  %v1887_v62 = vld [vmem:[%s4256_s4 + $0x90] sm:$0xff] }
 0x17a   : > { %1552 = vmatmul.mubr.f32.gmra.mxu0 %v3143_v25  ;;  %1622 = vmatprep.subr.mxu1 %v991_v1  ;;  %v1070_v25 = vld [vmem:[%s4254_s2 + $0x8d0] sm:$0xff]  ;;  %v1885_v1 = vld [vmem:[%s4256_s4 + $0x80] sm:$0xff] }
 0x17b   : > { %1681 = vmatprep.subr.mxu0 %v1075_v32  ;;  %1557 = vmatprep.mubr.f32.mxu0 %v3191_v54  ;;  %v1067_v54 = vld [vmem:[%s4254_s2 + $0x8b8] sm:$0xff]  ;;  %v1871_v8 = vld [vmem:[%s4256_s4 + $0x10] sm:$0xff]  ;;  %v1869_v32 = vld [vmem:[%s4256_s4] sm:$0xff] }
 0x17c   : > { %1623 = vmatpush2.msra.mxu1 %v990_v20  ;;  %1682 = vmatpush1.msra.mxu0 %v1074_v3 }
 0x17d   : > { %1624 = vmatprep.subr.mxu1 %v987_v4  ;;  %1683 = vmatprep.subr.mxu0 %v1071_v5  ;;  %v1916_v5 = vld [vmem:[%s4256_s4 + $0x178] sm:$0xff] }
 0x17e   : > { %1625 = vmatpush2.msra.mxu1 %v986_v6  ;;  %1684 = vmatpush1.msra.mxu0 %v1070_v25  ;;  %v1915_v6 = vld [vmem:[%s4256_s4 + $0x170] sm:$0xff] }
 0x17f   : > { %1558 = vmatmul.mubr.f32.gmra.mxu0 %v3196_v9  ;;  %1626 = vmatprep.subr.mxu1 %v983_v7  ;;  %v1058_v9 = vld [vmem:[%s4254_s2 + $0x870] sm:$0xff]  ;;  %v1914_v7 = vld [vmem:[%s4256_s4 + $0x168] sm:$0xff] }
 0x180   : > { %1685 = vmatprep.subr.mxu0 %v1067_v54  ;;  %1627 = vmatpush2.msra.mxu1 %v982_v13  ;;  %v1913_v54 = vld [vmem:[%s4256_s4 + $0x160] sm:$0xff] }
 0x181   : > { %1686 = vmatpush1.msra.mxu0 %v1066_v16  ;;  %2189 = vmatprep.mubr.msk.f32.mxu0 %vm1128_vm3, %v3336_v45  ;;  %v1054_v45 = vld [vmem:[%s4254_s2 + $0x850] sm:$0xff]  ;;  %v1912_v16 = vld [vmem:[%s4256_s4 + $0x158] sm:$0xff] }
 0x182   : > { %1629 = vmatmul.mubr.f32.vlgmr.msra.gmra.mxu1 %v3207_v15  ;;  %1687 = vmatprep.subr.mxu0 %v1063_v18  ;;  %v1051_v15 = vld [vmem:[%s4254_s2 + $0x838] sm:$0xff]  ;;  %v1911_v18 = vld [vmem:[%s4256_s4 + $0x150] sm:$0xff] }
 0x183   : > { %1634 = vmatprep.mubr.f32.mxu1 %v3239_v39  ;;  %1688 = vmatpush1.msra.mxu0 %v1062_v21  ;;  %v1050_v39 = vld [vmem:[%s4254_s2 + $0x830] sm:$0xff] }
 0x184   : > { %1689 = vmatprep.subr.mxu0 %v1059_v40  ;;  %2199 = vmatprep.subr.mxu1 %v1900_v27  ;;  %v1910_v40 = vld [vmem:[%s4256_s4 + $0x148] sm:$0xff] }
 0x185   : > { %1690 = vmatpush1.msra.mxu0 %v1058_v9  ;;  %2200 = vmatpush3.msra.mxu1 %v1884_v46 }
 0x186   : > { %1635 = vmatmul.mubr.f32.gmra.mxu1 %v3234_v36  ;;  %1691 = vmatprep.subr.mxu0 %v1055_v23  ;;  %v1046_v36 = vld [vmem:[%s4254_s2 + $0x810] sm:$0xff]  ;;  %v1909_v23 = vld [vmem:[%s4256_s4 + $0x140] sm:$0xff] }
 0x187   : > { %1640 = vmatprep.mubr.f32.mxu1 %v3252_v51  ;;  %1692 = vmatpush1.msra.mxu0 %v1054_v45  ;;  %v1127_v51 = vld [vmem:[%s4254_s2 + $0xa98] sm:$0xf] }
 0x188   : > { %1693 = vmatprep.subr.mxu0 %v1051_v15  ;;  %2201 = vmatprep.subr.mxu1 %v1899_v29  ;;  %v1908_v15 = vld [vmem:[%s4256_s4 + $0x138] sm:$0xff] }
 0x189   : > { %1694 = vmatpush1.msra.mxu0 %v1050_v39  ;;  %v1904_v29 = vld [vmem:[%s4256_s4 + $0x118] sm:$0xff] }
 0x18a   : > { %1641 = vmatmul.mubr.f32.gmra.mxu1 %v3261_v57  ;;  %1695 = vmatprep.subr.mxu0 %v1047_v49  ;;  %v1123_v57 = vld [vmem:[%s4254_s2 + $0xa78] sm:$0xff]  ;;  %v1907_v49 = vld [vmem:[%s4256_s4 + $0x130] sm:$0xff] }
 0x18b   : > { %1646 = vmatprep.mubr.f32.mxu1 %v3288_v11  ;;  %1696 = vmatpush1.msra.mxu0 %v1046_v36  ;;  %v1883_v11 = vld [vmem:[%s4256_s4 + $0x70] sm:$0xff]  ;;  %v1906_v36 = vld [vmem:[%s4256_s4 + $0x128] sm:$0xff] }
 0x18c   : > { %2187 = vmatprep.subr.msk.mxu0 %vm1147_vm2, %v1127_v51  ;;  %2202 = vmatpush3.msra.mxu1 %v1883_v11  ;;  %v1902_v11 = vld [vmem:[%s4256_s4 + $0x108] sm:$0xff] }
 0x18d   : > { %2188 = vmatpush2.msk.msra.mxu0 %vm1147_vm2, %v1126_v24  ;;  %2203 = vmatprep.subr.mxu1 %v1898_v63  ;;  %v1905_v24 = vld [vmem:[%s4256_s4 + $0x120] sm:$0xff] }
 0x18e   : > { %1647 = vmatmul.mubr.f32.gmra.mxu1 %v3293_v14  ;;  %1721 = vmatprep.subr.mxu0 %v1123_v57  ;;  %v1114_v14 = vld [vmem:[%s4254_s2 + $0xa30] sm:$0xff]  ;;  %v1901_v63 = vld [vmem:[%s4256_s4 + $0x100] sm:$0xff] }
 0x18f   : > { %1652 = vmatprep.mubr.f32.mxu1 %v3319_v31  ;;  %1722 = vmatpush2.msra.mxu0 %v1122_v30  ;;  %v1882_v31 = vld [vmem:[%s4256_s4 + $0x68] sm:$0xff]  ;;  %v1903_v30 = vld [vmem:[%s4256_s4 + $0x110] sm:$0xff] }
 0x190   : > { %1723 = vmatprep.subr.mxu0 %v1119_v43  ;;  %2204 = vmatpush3.msra.mxu1 %v1882_v31 }
 0x191   : > { %1724 = vmatpush2.msra.mxu0 %v1118_v33  ;;  %2205 = vmatprep.subr.mxu1 %v1897_v44 }
 0x192   : > { %1653 = vmatmul.mubr.f32.gmra.mxu1 %v3325_v35  ;;  %1725 = vmatprep.subr.mxu0 %v1115_v38  ;;  %v1896_v35 = vld [vmem:[%s4256_s4 + $0xd8] sm:$0xff] }
 0x193   : > { %1658 = vmatprep.mubr.f32.mxu1 %v3352_v53  ;;  %1726 = vmatpush2.msra.mxu0 %v1114_v14  ;;  %v1880_v53 = vld [vmem:[%s4256_s4 + $0x58] sm:$0xff]  ;;  %v1923_v14 = vld [vmem:[%s4256_s4 + $0x1b0] sm:$0xff] }
 0x194   : > { %1727 = vmatprep.subr.mxu0 %v1111_v41  ;;  %2206 = vmatpush3.msra.mxu1 %v1881_v47  ;;  %v1921_v47 = vld [vmem:[%s4256_s4 + $0x1a0] sm:$0xff] }
 0x195   : > { %1728 = vmatpush2.msra.mxu0 %v1110_v42  ;;  %2207 = vmatprep.subr.mxu1 %v1896_v35  ;;  %v1922_v42 = vld [vmem:[%s4256_s4 + $0x1a8] sm:$0xff] }
 0x196   : > { %1659 = vmatmul.mubr.f32.gmra.mxu1 %v3357_v60  ;;  %1730 = vmatmul.mubr.f32.vlgmr.msra.gmra.mxu0 %v3365_v2  ;;  %v1894_v60 = vld [vmem:[%s4256_s4 + $0xc8] sm:$0xff] }
 0x197   : > { %2190 = vmatprep.mubr.msk.f32.mxu0 %vm1128_vm3, %v3383_v12  ;;  %1998 = vmatprep.subr.mxu0 %v2489_v0  ;;  %v1878_v2 = vld [vmem:[%s4256_s4 + $0x48] sm:$0xff]  ;;  %v1893_v12 = vld [vmem:[%s4256_s4 + $0xc0] sm:$0xff] }
 0x198   : > { %2208 = vmatpush3.msra.mxu1 %v1880_v53  ;;  %1999 = vmatpush1.msra.mxu0 %v1916_v5  ;;  %v1920_v53 = vld [vmem:[%s4256_s4 + $0x198] sm:$0xff] }
 0x199   : > { %2209 = vmatprep.subr.mxu1 %v1895_v55  ;;  %2000 = vmatprep.subr.mxu0 %v2489_v0 }
 0x19a   : > { %1736 = vmatmul.mubr.f32.gmra.mxu0 %v3396_v22  ;;  %2210 = vmatpush3.msra.mxu1 %v1879_v48  ;;  %v1892_v22 = vld [vmem:[%s4256_s4 + $0xb8] sm:$0xff]  ;;  %v1919_v48 = vld [vmem:[%s4256_s4 + $0x190] sm:$0xff] }
 0x19b   : > { %2191 = vmatprep.mubr.msk.f32.mxu0 %vm1128_vm3, %v3421_v37  ;;  %2211 = vmatprep.subr.mxu1 %v1894_v60  ;;  %v1876_v37 = vld [vmem:[%s4256_s4 + $0x38] sm:$0xff]  ;;  %v1918_v60 = vld [vmem:[%s4256_s4 + $0x188] sm:$0xff] }
 0x19c   : > { %2212 = vmatpush3.msra.mxu1 %v1878_v2  ;;  %2001 = vmatpush1.msra.mxu0 %v1915_v6  ;;  %v1774_v6 = vld [vmem:[%s4255_s3 + $0x40] sm:$0xff] }
 0x19d   : > { %2213 = vmatprep.subr.mxu1 %v1893_v12  ;;  %2002 = vmatprep.subr.mxu0 %v2489_v0 }
 0x19e   : > { %1742 = vmatmul.mubr.f32.gmra.mxu0 %v3433_v26  ;;  %2214 = vmatpush3.msra.mxu1 %v1877_v17  ;;  %v1890_v26 = vld [vmem:[%s4256_s4 + $0xa8] sm:$0xff]  ;;  %v1917_v17 = vld [vmem:[%s4256_s4 + $0x180] sm:$0xff] }
 0x19f   : > { %2192 = vmatprep.mubr.msk.f32.mxu0 %vm1128_vm3, %v3452_v59  ;;  %2215 = vmatprep.subr.mxu1 %v1892_v22  ;;  %v1874_v59 = vld [vmem:[%s4256_s4 + $0x28] sm:$0xff] }
 0x1a0   : > { %2216 = vmatpush3.msra.mxu1 %v1876_v37  ;;  %2003 = vmatpush1.msra.mxu0 %v1914_v7 }
 0x1a1   : > { %2217 = vmatprep.subr.mxu1 %v1891_v50  ;;  %2004 = vmatprep.subr.mxu0 %v2489_v0 }
 0x1a2   : > { %1748 = vmatmul.mubr.f32.gmra.mxu0 %v3464_v58  ;;  %2218 = vmatpush3.msra.mxu1 %v1875_v52  ;;  %v1888_v58 = vld [vmem:[%s4256_s4 + $0x98] sm:$0xff] }
 0x1a3   : > { %2193 = vmatprep.mubr.msk.f32.mxu0 %vm1128_vm3, %v3483_v10  ;;  %2219 = vmatprep.subr.mxu1 %v1890_v26  ;;  %v1872_v10 = vld [vmem:[%s4256_s4 + $0x18] sm:$0xff] }
 0x1a4   : > { %2220 = vmatpush3.msra.mxu1 %v1874_v59  ;;  %2005 = vmatpush1.msra.mxu0 %v1913_v54  ;;  %v1767_v54 = vld [vmem:[%s4255_s3 + $0x8] sm:$0xff] }
 0x1a5   : > { %2221 = vmatprep.subr.mxu1 %v1889_v56  ;;  %2006 = vmatprep.subr.mxu0 %v2489_v0 }
 0x1a6   : > { %1754 = vmatmul.mubr.f32.gmra.mxu0 %v3495_v19  ;;  %2222 = vmatpush3.msra.mxu1 %v1873_v61  ;;  %v1886_v19 = vld [vmem:[%s4256_s4 + $0x88] sm:$0xff] }
 0x1a7   : > { %2194 = vmatprep.mubr.msk.f32.mxu0 %vm1128_vm3, %v3514_v28  ;;  %2223 = vmatprep.subr.mxu1 %v1888_v58  ;;  %v1870_v28 = vld [vmem:[%s4256_s4 + $0x8] sm:$0xff] }
 0x1a8   : > { %2224 = vmatpush3.msra.mxu1 %v1872_v10  ;;  %2007 = vmatpush1.msra.mxu0 %v1912_v16 }
 0x1a9   : > { %2225 = vmatprep.subr.mxu1 %v1887_v62  ;;  %2008 = vmatprep.subr.mxu0 %v2489_v0 }
 0x1aa   : > { %1760 = vmatmul.mubr.f32.gmra.mxu0 %v3526_v34  ;;  %2226 = vmatpush3.msra.mxu1 %v1871_v8  ;;  %v1770_v8 = vld [vmem:[%s4255_s3 + $0x20] sm:$0xff] }
 0x1ab   : > { %2227 = vmatprep.subr.mxu1 %v1886_v19  ;;  %2009 = vmatpush1.msra.mxu0 %v1911_v18 }
 0x1ac   : > { %2228 = vmatpush3.msra.mxu1 %v1870_v28  ;;  %2010 = vmatprep.subr.mxu0 %v2489_v0 }
 0x1ad   : > { %2229 = vmatprep.subr.mxu1 %v1885_v1  ;;  %2011 = vmatpush1.msra.mxu0 %v1910_v40  ;;  %v1766_v1 = vld [vmem:[%s4255_s3] sm:$0xff] }
 0x1ae   : > { %2230 = vmatpush3.msra.mxu1 %v1869_v32  ;;  %2012 = vmatprep.subr.mxu0 %v2489_v0 }
 0x1af   : > { %2013 = vmatpush1.msra.mxu0 %v1909_v23  ;;  %v1778_v23 = vld [vmem:[%s4255_s3 + $0x60] sm:$0xff] }
 0x1b0   : > { %2014 = vmatprep.subr.mxu0 %v2489_v0 }
 0x1b1   : > { %2015 = vmatpush1.msra.mxu0 %v1908_v15 }
 0x1b2   : > { %2016 = vmatprep.subr.mxu0 %v2489_v0 }
 0x1b3   : > { %2017 = vmatpush1.msra.mxu0 %v1907_v49 }
 0x1b4   : > { %2018 = vmatprep.subr.mxu0 %v2489_v0 }
 0x1b5   : > { %2019 = vmatpush1.msra.mxu0 %v1906_v36 }
 0x1b6   : > { %2020 = vmatprep.subr.mxu0 %v2489_v0 }
 0x1b7   : > { %2021 = vmatpush1.msra.mxu0 %v1905_v24  ;;  %v1782_v24 = vld [vmem:[%s4255_s3 + $0x80] sm:$0xff] }
 0x1b8   : > { %2022 = vmatprep.subr.mxu0 %v2489_v0 }
 0x1b9   : > { %2023 = vmatpush1.msra.mxu0 %v1904_v29 }
 0x1ba   : > { %2024 = vmatprep.subr.mxu0 %v2489_v0 }
 0x1bb   : > { %2025 = vmatpush1.msra.mxu0 %v1903_v30 }
 0x1bc   : > { %2026 = vmatprep.subr.mxu0 %v2489_v0 }
 0x1bd   : > { %2027 = vmatpush1.msra.mxu0 %v1902_v11 }
 0x1be   : > { %2028 = vmatprep.subr.mxu0 %v2489_v0 }
 0x1bf   : > { %2029 = vmatpush1.msra.mxu0 %v1901_v63 }
 0x1c0   : > { %2048 = vmatprep.subr.mxu0 %v2489_v0 }
 0x1c1   : > { %2049 = vmatpush2.msra.mxu0 %v1923_v14  ;;  %v1783_v14 = vld [vmem:[%s4255_s3 + $0x88] sm:$0xff] }
 0x1c2   : > { %2050 = vmatprep.subr.mxu0 %v2489_v0 }
 0x1c3   : > { %v3995_v20 = vpop.f32.mrf.mxu1  ;;  %2051 = vmatpush2.msra.mxu0 %v1922_v42 }
 0x1c4   : > { %2052 = vmatprep.subr.mxu0 %v2489_v0 }
 0x1c5   : > { %v3997_v34 = vpop.f32.mrf.mxu1  ;;  %2053 = vmatpush2.msra.mxu0 %v1921_v47 }
 0x1c6   : > { %2054 = vmatprep.subr.mxu0 %v2489_v0 }
 0x1c7   : > { %v3999_v3 = vpop.f32.mrf.mxu1  ;;  %2055 = vmatpush2.msra.mxu0 %v1920_v53 }
 0x1c8   : > { %2056 = vmatprep.subr.mxu0 %v2489_v0 }
 0x1c9   : > { %v4001_v4 = vpop.f32.mrf.mxu1  ;;  %2057 = vmatpush2.msra.mxu0 %v1919_v48 }
 0x1ca   : > { %2058 = vmatprep.subr.mxu0 %v2489_v0 }
 0x1cb   : > { %v4010_v25 = vpop.f32.mrf.mxu1  ;;  %2059 = vmatpush2.msra.mxu0 %v1918_v60 }
 0x1cc   : > { %2060 = vmatprep.subr.mxu0 %v2489_v0 }
 0x1cd   : > { %v4020_v13 = vpop.f32.mrf.mxu1  ;;  %2061 = vmatpush2.msra.mxu0 %v1917_v17 }
 0x1cf   : > { %v4030_v21 = vpop.f32.mrf.mxu1 }
 0x1d1   : > { %v4042_v45 = vpop.f32.mrf.mxu1 }
 0x1d3   : > { %v4054_v27 = vpop.f32.mrf.mxu1 }
 0x1d5   : > { %v4064_v46 = vpop.f32.mrf.mxu1 }
 0x1d8   : > { %v4074_v43 = vpop.f32.mrf.mxu1 }
 0x1da   : > { %v4084_v38 = vpop.f32.mrf.mxu1 }
 0x1dc   : > { %v4036_v9 = vpop.f32.mrf.mxu0 }
 0x1dd   : > { %v1328_v26 = vadd.f32 %v4036_v9, %v3995_v20  ;;  %v1775_v9 = vld [vmem:[%s4255_s3 + $0x48] sm:$0xff] }
 0x1de   : > { %v4048_v39 = vpop.f32.mrf.mxu0 }
 0x1df   : > { %v1330_v62 = vadd.f32 %v4048_v39, %v3997_v34  ;;  %v1771_v34 = vld [vmem:[%s4255_s3 + $0x28] sm:$0xff] }
 0x1e0   : > { %v1333_v51 = vpop.f32.mrf.mxu0 }
 0x1e1   : > { %v1334_v52 = vadd.f32 %v1333_v51, %v3999_v3  ;;  %v1779_v51 = vld [vmem:[%s4255_s3 + $0x68] sm:$0xff] }
 0x1e2   : > { %v1335_v57 = vpop.f32.mrf.mxu0 }
 0x1e3   : > { %v1336_v59 = vadd.f32 %v1335_v57, %v4001_v4 }
 0x1e4   : > { %v1339_v33 = vpop.f32.mrf.mxu0 }
 0x1e5   : > { %v1340_v56 = vadd.f32 %v1339_v33, %v4010_v25 }
 0x1e6   : > { %v1341_v41 = vpop.f32.mrf.mxu0 }
 0x1e7   : > { %v1342_v19 = vadd.f32 %v1341_v41, %v4020_v13 }
 0x1e9   : > { %v1345_v35 = vpop.f32.mrf.mxu0 }
 0x1ea   : > { %v1346_v28 = vadd.f32 %v1345_v35, %v4030_v21  ;;  %v1786_v35 = vld [vmem:[%s4255_s3 + $0xa0] sm:$0xf] }
 0x1eb   : > { %v1347_v2 = vpop.f32.mrf.mxu0 }
 0x1ec   : > { %v1348_v4 = vadd.f32 %v1347_v2, %v4042_v45 }
 0x1ee   : > { %v1351_v37 = vpop.f32.mrf.mxu0 }
 0x1ef   : > { %v1352_v25 = vadd.f32 %v1351_v37, %v4054_v27 }
 0x1f0   : > { %v1353_v61 = vpop.f32.mrf.mxu0 }
 0x1f1   : > { %v1354_v21 = vadd.f32 %v1353_v61, %v4064_v46 }
 0x1f3   : > { %v1357_v7 = vpop.f32.mrf.mxu0 }
 0x1f4   : > { %v1358_v63 = vadd.f32 %v1357_v7, %v4074_v43 }
 0x1f5   : > { %v1428_v31 = vpop.f32.mrf.mxu1  ;;  %v1359_v29 = vpop.f32.mrf.mxu0 }
 0x1f6   : > { %v1429_v0 = vadd.f32 %v1428_v31, %v1328_v26  ;;  %v1360_v53 = vadd.f32 %v1359_v29, %v4084_v38 }
 0x1f7   : > { %v1430_v44 = vpop.f32.mrf.mxu1 }
 0x1f8   : > { %v1431_v5 = vadd.f32 %v1430_v44, %v1330_v62  ;;  %v1790_v40 = vmul.f32 %v1766_v1, %v1429_v0 }
 0x1fa   : > { %v1791_v36 = vmul.f32 %v1767_v54, %v1431_v5 }
 0x1fb   : > { %v1434_v55 = vpop.f32.mrf.mxu1 }
 0x1fc   : > { %v1435_v58 = vadd.f32 %v1434_v55, %v1334_v52 }
 0x1fd   : > { %v1436_v12 = vpop.f32.mrf.mxu1 }
 0x1fe   : > { %v1437_v32 = vadd.f32 %v1436_v12, %v1336_v59  ;;  %v1794_v13 = vmul.f32 %v1770_v8, %v1435_v58  ;;  %v1787_v12 = vld [vmem:[%s4255_s3 + $0xa8] sm:$0xf] }
 0x200   : > { %v1440_v22 = vpop.f32.mrf.mxu1  ;;  %v1795_v15 = vmul.f32 %v1771_v34, %v1437_v32  ;;  %v1814_v57 = vadd.f32 %v1794_v13, %v1790_v40 }
 0x201   : > { %v1441_v20 = vadd.f32 %v1440_v22, %v1340_v56 }
 0x202   : > { %v1442_v50 = vpop.f32.mrf.mxu1  ;;  %v1826_v41 = vadd.f32 %v1795_v15, %v1791_v36 }
 0x203   : > { %v1443_v16 = vadd.f32 %v1442_v50, %v1342_v19  ;;  %v1798_v39 = vmul.f32 %v1774_v6, %v1441_v20 }
 0x205   : > { %v1446_v10 = vpop.f32.mrf.mxu1  ;;  %v1799_v30 = vmul.f32 %v1775_v9, %v1443_v16  ;;  %v1815_v31 = vadd.f32 %v1814_v57, %v1798_v39 }
 0x206   : > { %v1447_v18 = vadd.f32 %v1446_v10, %v1346_v28 }
 0x207   : > { %v1448_v3 = vpop.f32.mrf.mxu1  ;;  %v1827_v48 = vadd.f32 %v1826_v41, %v1799_v30 }
 0x208   : > { %v1449_v49 = vadd.f32 %v1448_v3, %v1348_v4  ;;  %v1802_v11 = vmul.f32 %v1778_v23, %v1447_v18 }
 0x20a   : > { %v1452_v45 = vpop.f32.mrf.mxu1  ;;  %v1803_v42 = vmul.f32 %v1779_v51, %v1449_v49  ;;  %v1816_v60 = vadd.f32 %v1815_v31, %v1802_v11 }
 0x20b   : > { %v1453_v27 = vadd.f32 %v1452_v45, %v1352_v25 }
 0x20c   : > { %v1454_v46 = vpop.f32.mrf.mxu1  ;;  %v1828_v37 = vadd.f32 %v1827_v48, %v1803_v42 }
 0x20d   : > { %v1455_v33 = vadd.f32 %v1454_v46, %v1354_v21  ;;  %v1806_v44 = vmul.f32 %v1782_v24, %v1453_v27 }
 0x20f   : > { %v1458_v47 = vpop.f32.mrf.mxu1  ;;  %v1807_v2 = vmul.f32 %v1783_v14, %v1455_v33  ;;  %v1817_v50 = vadd.f32 %v1816_v60, %v1806_v44  ;;  %v1772_v60 = vld [vmem:[%s4255_s3 + $0x30] sm:$0xff] }
 0x210   : > { %v1459_v55 = vadd.f32 %v1458_v47, %v1358_v63 }
 0x211   : > { %v1460_v43 = vpop.f32.mrf.mxu1  ;;  %v1829_v59 = vadd.f32 %v1828_v37, %v1807_v2  ;;  %v1777_v37 = vld [vmem:[%s4255_s3 + $0x58] sm:$0xff] }
 0x212   : > { %v1810_v17 = vmul.f32 %v1786_v35, %v1459_v55  ;;  %v1461_v22 = vadd.f32 %v1460_v43, %v1360_v53  ;;  %v1773_v53 = vld [vmem:[%s4255_s3 + $0x38] sm:$0xff] }
 0x214   : > { %v1818_v52 = vsel %vm1147_vm2, %v1810_v17, 0.0  ;;  %v1811_v26 = vmul.f32 %v1787_v12, %v1461_v22  ;;  %v1769_v17 = vld [vmem:[%s4255_s3 + $0x18] sm:$0xff] }
 0x215   : > { %v1819_v56 = vadd.f32 %v1818_v52, %v1817_v50 }
 0x216   : > { %v1830_v38 = vsel %vm1147_vm2, %v1811_v26, 0.0  ;;  %v1768_v26 = vld [vmem:[%s4255_s3 + $0x10] sm:$0xff] }
 0x217   : > { %v1820_v61 = vrot.slane %v1819_v56, 4  ;;  %v1831_v58 = vadd.f32 %v1830_v38, %v1829_v59 }
 0x219   : > { %v1821_v10 = vadd.f32 %v1820_v61, %v1819_v56  ;;  %v1832_v62 = vrot.slane %v1831_v58, 4  ;;  %v1776_v56 = vld [vmem:[%s4255_s3 + $0x50] sm:$0xff] }
 0x21b   : > { %v1822_v0 = vrot.slane %v1821_v10, 2  ;;  %v1833_v8 = vadd.f32 %v1832_v62, %v1831_v58  ;;  %v1781_v62 = vld [vmem:[%s4255_s3 + $0x78] sm:$0xff] }
 0x21d   : > { %v1823_v19 = vadd.f32 %v1822_v0, %v1821_v10  ;;  %v1834_v28 = vrot.slane %v1833_v8, 2 }
 0x21f   : > { %v1835_v1 = vadd.f32 %v1834_v28, %v1833_v8  ;;  %v1824_v32 = vrot.slane %v1823_v19, 1  ;;  %v1780_v28 = vld [vmem:[%s4255_s3 + $0x70] sm:$0xff] }
 0x221   : > { %v1836_v20 = vrot.slane %v1835_v1, 1  ;;  %v1825_v4 = vadd.f32 %v1824_v32, %v1823_v19 }
 0x223   : > { %v1837_v3 = vadd.f32 %v1836_v20, %v1835_v1 }
 0x225   : > { %1992 = vmatprep.mubr.f32.mxu1 %v1837_v3 }
 0x226   : > { %1993 = vmatmul.mubr.f32.vlgmr.msra.gmra.mxu1 %v1825_v4  ;;  %v1529_v5 = vpop.f32.mrf.mxu0 }
 0x228   : > { %v1531_v34 = vpop.f32.mrf.mxu0 }
 0x22b   : > { %v1535_v6 = vpop.f32.mrf.mxu0 }
 0x22d   : > { %v1537_v25 = vpop.f32.mrf.mxu0 }
 0x230   : > { %v1541_v7 = vpop.f32.mrf.mxu0 }
 0x232   : > { %v1543_v54 = vpop.f32.mrf.mxu0 }
 0x235   : > { %v1547_v13 = vpop.f32.mrf.mxu0 }
 0x237   : > { %v1549_v18 = vpop.f32.mrf.mxu0 }
 0x23a   : > { %v1553_v9 = vpop.f32.mrf.mxu0 }
 0x23c   : > { %v1555_v45 = vpop.f32.mrf.mxu0 }
 0x23f   : > { %v1559_v39 = vpop.f32.mrf.mxu0 }
 0x241   : > { %v4166_v27 = vpop.f32.mrf.mxu0 }
 0x242   : > { %v1630_v16 = vpop.f32.mrf.mxu1 }
 0x243   : > { %v1631_v42 = vadd.f32 %v1630_v16, %v1529_v5 }
 0x244   : > { %v1632_v21 = vpop.f32.mrf.mxu1 }
 0x245   : > { %v1633_v14 = vadd.f32 %v1632_v21, %v1531_v34 }
 0x246   : > { %v1636_v40 = vpop.f32.mrf.mxu1 }
 0x247   : > { %v1637_v33 = vadd.f32 %v1636_v40, %v1535_v6 }
 0x248   : > { %v1638_v23 = vpop.f32.mrf.mxu1 }
 0x249   : > { %v1639_v11 = vadd.f32 %v1638_v23, %v1537_v25  ;;  %v1784_v25 = vld [vmem:[%s4255_s3 + $0x90] sm:$0xff] }
 0x24a   : > { %v1642_v15 = vpop.f32.mrf.mxu1 }
 0x24b   : > { %v1643_v44 = vadd.f32 %v1642_v15, %v1541_v7 }
 0x24c   : > { %v1644_v49 = vpop.f32.mrf.mxu1 }
 0x24d   : > { %v1645_v41 = vadd.f32 %v1644_v49, %v1543_v54 }
 0x24e   : > { %v1648_v36 = vpop.f32.mrf.mxu1 }
 0x24f   : > { %v1649_v43 = vadd.f32 %v1648_v36, %v1547_v13 }
 0x250   : > { %v1650_v24 = vpop.f32.mrf.mxu1 }
 0x251   : > { %v1651_v52 = vadd.f32 %v1650_v24, %v1549_v18  ;;  %v1785_v18 = vld [vmem:[%s4255_s3 + $0x98] sm:$0xff] }
 0x252   : > { %v1654_v57 = vpop.f32.mrf.mxu1 }
 0x253   : > { %v1655_v0 = vadd.f32 %v1654_v57, %v1553_v9 }
 0x254   : > { %v1656_v47 = vpop.f32.mrf.mxu1 }
 0x255   : > { %v1657_v4 = vadd.f32 %v1656_v47, %v1555_v45 }
 0x256   : > { %v1731_v51 = vpop.f32.mrf.mxu0  ;;  %v1660_v38 = vpop.f32.mrf.mxu1 }
 0x257   : > { %v1732_v12 = vadd.f32 %v1731_v51, %v1631_v42  ;;  %v1661_v21 = vadd.f32 %v1660_v38, %v1559_v39  ;;  %v1788_v51 = vld [vmem:[%s4255_s3 + $0xb0] sm:$0xf] }
 0x258   : > { %v1733_v46 = vpop.f32.mrf.mxu0  ;;  %v1662_v7 = vpop.f32.mrf.mxu1 }
 0x259   : > { %v1734_v48 = vadd.f32 %v1733_v46, %v1633_v14  ;;  %v1792_v32 = vmul.f32 %v1768_v26, %v1732_v12  ;;  %v1663_v24 = vadd.f32 %v1662_v7, %v4166_v27 }
 0x25a   : > { %v1737_v29 = vpop.f32.mrf.mxu0 }
 0x25b   : > { %v1738_v35 = vadd.f32 %v1737_v29, %v1637_v33  ;;  %v1793_v8 = vmul.f32 %v1769_v17, %v1734_v48  ;;  %v1789_v33 = vld [vmem:[%s4255_s3 + $0xb8] sm:$0xf] }
 0x25c   : > { %v1739_v30 = vpop.f32.mrf.mxu0 }
 0x25d   : > { %v1740_v31 = vadd.f32 %v1739_v30, %v1639_v11  ;;  %v1796_v61 = vmul.f32 %v1772_v60, %v1738_v35  ;;  %v1851_v40 = vsel %vm1850_vm4, %v1793_v8, 0.0 }
 0x25e   : > { %v1743_v63 = vpop.f32.mrf.mxu0 }
 0x25f   : > { %v1744_v22 = vadd.f32 %v1743_v63, %v1643_v44  ;;  %v1797_v59 = vmul.f32 %v1773_v53, %v1740_v31  ;;  %v1838_v54 = vadd.f32 %v1796_v61, %v1792_v32 }
 0x260   : > { %v1745_v55 = vpop.f32.mrf.mxu0 }
 0x261   : > { %v1746_v2 = vadd.f32 %v1745_v55, %v1645_v41  ;;  %v1800_v20 = vmul.f32 %v1776_v56, %v1744_v22  ;;  %v1852_v5 = vsel %vm1850_vm4, %v1797_v59, 0.0 }
 0x262   : > { %v1749_v50 = vpop.f32.mrf.mxu0  ;;  %v1853_v45 = vadd.f32 %v1852_v5, %v1851_v40 }
 0x263   : > { %v1750_v58 = vadd.f32 %v1749_v50, %v1649_v43  ;;  %v1801_v19 = vmul.f32 %v1777_v37, %v1746_v2  ;;  %v1839_v15 = vadd.f32 %v1838_v54, %v1800_v20 }
 0x264   : > { %v1751_v10 = vpop.f32.mrf.mxu0 }
 0x265   : > { %v1752_v1 = vadd.f32 %v1751_v10, %v1651_v52  ;;  %v1804_v13 = vmul.f32 %v1780_v28, %v1750_v58  ;;  %v1854_v9 = vsel %vm1850_vm4, %v1801_v19, 0.0  ;;  %v1924_v58 = vld [vmem:[%s4257_s5] sm:$0x1] }
 0x266   : > { %v1755_v3 = vpop.f32.mrf.mxu0  ;;  %v1855_v39 = vadd.f32 %v1854_v9, %v1853_v45 }
 0x267   : > { %v1805_v34 = vmul.f32 %v1781_v62, %v1752_v1  ;;  %v1756_v6 = vadd.f32 %v1755_v3, %v1655_v0  ;;  %v1840_v30 = vadd.f32 %v1839_v15, %v1804_v13 }
 0x268   : > { %v1757_v16 = vpop.f32.mrf.mxu0 }
 0x269   : > { %v1758_v23 = vadd.f32 %v1757_v16, %v1657_v4  ;;  %v1808_v49 = vmul.f32 %v1784_v25, %v1756_v6  ;;  %v1856_v46 = vsel %vm1850_vm4, %v1805_v34, 0.0 }
 0x26a   : > { %v1761_v36 = vpop.f32.mrf.mxu0  ;;  %v1857_v31 = vadd.f32 %v1856_v46, %v1855_v39 }
 0x26b   : > { %v1809_v29 = vmul.f32 %v1785_v18, %v1758_v23  ;;  %v1762_v57 = vadd.f32 %v1761_v36, %v1661_v21  ;;  %v1841_v42 = vadd.f32 %v1840_v30, %v1808_v49 }
 0x26c   : > { %v1763_v11 = vpop.f32.mrf.mxu0 }
 0x26d   : > { %v1858_v63 = vsel %vm1850_vm4, %v1809_v29, 0.0  ;;  %v1812_v14 = vmul.f32 %v1788_v51, %v1762_v57  ;;  %v1764_v41 = vadd.f32 %v1763_v11, %v1663_v24 }
 0x26e   : > { %v1859_v47 = vadd.f32 %v1858_v63, %v1857_v31 }
 0x26f   : > { %v1842_v27 = vsel %vm1147_vm2, %v1812_v14, 0.0  ;;  %v1813_v44 = vmul.f32 %v1789_v33, %v1764_v41 }
 0x270   : > { %v1843_v35 = vadd.f32 %v1842_v27, %v1841_v42 }
 0x271   : > { %v1861_v53 = vsel %vm1860_vm5, %v1813_v44, 0.0 }
 0x272   : > { %v1844_v55 = vrot.slane %v1843_v35, 4  ;;  %v1862_v48 = vadd.f32 %v1861_v53, %v1859_v47 }
 0x274   : > { %v1845_v60 = vadd.f32 %v1844_v55, %v1843_v35  ;;  %v1863_v2 = vrot.slane %v1862_v48, 4 }
 0x276   : > { %v1846_v43 = vrot.slane %v1845_v60, 2  ;;  %v1864_v12 = vadd.f32 %v1863_v2, %v1862_v48 }
 0x278   : > { %v1847_v17 = vadd.f32 %v1846_v43, %v1845_v60  ;;  %v1865_v22 = vrot.slane %v1864_v12, 2 }
 0x27a   : > { %v1866_v37 = vadd.f32 %v1865_v22, %v1864_v12  ;;  %v1848_v50 = vrot.slane %v1847_v17, 1 }
 0x27c   : > { %v1867_v52 = vrot.slane %v1866_v37, 1  ;;  %v1849_v59 = vadd.f32 %v1848_v50, %v1847_v17 }
 0x27e   : > { %v1868_v26 = vadd.f32 %v1867_v52, %v1866_v37 }
 0x280   : > { %2195 = vmatprep.mubr.msk.f32.mxu0 %vm1850_vm4, %v1868_v26 }
 0x281   : > { %2063 = vmatmul.mubr.f32.vlgmr.msra.gmra.mxu0 %v1849_v59 }
 0x2e6   : > { %v2231_v56 = vpop.f32.mrf.mxu1 }
 0x2e8   : > { %v2232_v38 = vpop.f32.mrf.mxu1 }
 0x2e9   : > { %v2233_v61 = vadd.f32 %v2232_v38, %v2231_v56 }
 0x2eb   : > { %v1995_v10 = vadd.f32 %v2233_v61, %v1924_v58 }
 0x341   : > { %v2064_v62 = vpop.f32.mrf.mxu0 }
 0x342   : > { %v2065_v0 = vadd.f32 %v2064_v62, %v1995_v10 }
 0x343   : > { %v2066_v8 = vpop.f32.mrf.mxu0 }
 0x344   : > { %v2069_v19 = vsel %vm2068_vm6, %v2065_v0, -inf }
 0x345   : > { %2070 = vmax.xlane.f32.xlu0 %v2069_v19 }
 0x3ce   : > { %v2071_v28 = vpop.xlane.xlu0 %2070 }
 0x3cf   : > { %v2072_v1 = vsub.f32 %v2065_v0, %v2071_v28 }
 0x3d1   : > { %v2073_v32 = vmul.f32 1.442695, %v2072_v1 }
 0x3d3   : > { %2423 = vpow2.f32 %v2073_v32 }
 0x3e0   : > { %v2424_v20 = vpop.eup %2423 }
 0x3e1   : > { %v2075_v3 = vsel %vm2068_vm6, %v2424_v20, 0.0 }
 0x3e2   : > { %2076 = vadd.xlane.f32.xlu0 %v2075_v3 }
 0x46b   : > { %v2077_v4 = vpop.xlane.xlu0 %2076 }
 0x46c   : > { %2425 = vlog2.f32 %v2077_v4 }
 0x479   : > { %v2426_v5 = vpop.eup %2425 }
 0x47a   : > { %v2079_v34 = vmul.f32 0.6931472, %v2426_v5 }
 0x47c   : > { %v2080_v6 = vsub.f32 %v2072_v1, %v2079_v34 }
 0x47e   : > { %2081 = vst.msk [vmem:[%s243_s13] sm:$0x1] %vm2068_vm6, %v2080_v6 }
 0x47f   : > { %2440 = shalt.err (!%p2437_p3)
}
 0x480   : > { %s2441_s28 = scalar_lea.hbm %s2093_s17, 16  ;;  %s2445_s10 = scalar_lea.hbm %s4258_s6, 32 }
 0x481   : > { %p2442_p4 = scmp.ne.s32.totalorder %s2093_s17, %s2441_s28  ;;  %p2446_p9 = scmp.lt.s32.totalorder %s2093_s17, %s4258_s6 }
 0x482   : > { %p2447_p10 = scmp.lt.s32.totalorder %s2445_s10, %s2441_s28 }
 0x483   : > { %p2443_p7 = pnand %p2442_p4, %p2564_p5 }
 0x484   : > { %p2448_p11 = por %p2447_p10, %p2446_p9 }
 0x485   : > { %p2444_p8 = pneg %p2443_p7 }
 0x487   : > { %p2449_p12 = pnand %p2448_p11, %p2444_p8 }
 0x489   : > { %2452 = shalt.err (!%p2449_p12)
}
 0x48a   : > { %2239 = dma.vmem_to_hbm [thread:$0]  (%p2564_p5), %s2096_s14, 16, %s2093_s17, %s2083_s18  }
 0x48b PF: > { %p2245_p13 = scmp.ge.s32.totalorder %s2487_s24, 2  ;;  %s2107_s13 = sand.u32 1, %s2475_s21  }
 0x48c   : > { %s2108_s15 = scalar_lea.sflag [#allocation3], %s2107_s13 }
 0x48d   : > { %p2242_p0 = pnand %p2245_p13, %p2568_p6 }
 0x48f   : > { %p2243_p1 = pneg %p2242_p0 }
 0x491   : > { %2470 = dma.done.wait (%p2243_p1), %s2108_s15, 16  }
 0x492   : > { %2472 = vsyncadd (%p2243_p1), %s2108_s15, 4294967280  ;;  %p16_p2 = scmp.ge.s32.totalorder %s2551_s27, 4   ;;  %s4261_s21 = smov %s2479_s22 }
 0x493   : > { %s4262_s22 = smov %s2483_s23  ;;  %s4263_s23 = smov %s2562_s30 }
 0x494   : > { %s4264_s24 = smov %s2551_s27  ;;  %18 = sbr.rel (!%p16_p2) target bundleno = 3 (0x3), region = 79 }
 0x499   :  { %2112 = vsyncpa [#allocation3], 1 }
 0x49a   :  { %2114 = vsyncpa [#allocation3 + $0x1], 1 }

</bundles_post_ra>
